<compile_context>
chip_gen: v7x
topology: tpu7x:2x2x1
jax: 0.10.0
libtpu: 0.0.40
codegen_flags: <defaults>
</compile_context>

<pallas_src>
import jax
import jax.numpy as jnp
from jax.experimental import pallas as pl
from jax.experimental.pallas import tpu as pltpu

LEAKY_SLOPE = 0.01  # PyTorch nn.LeakyReLU default negative_slope


def _leaky_relu(h):
    # Keep in f32 on all generations (v5e VPU has no bf16).
    return jnp.where(h > 0, h, LEAKY_SLOPE * h)


# ----------------------------------------------------------------------------
# Helpers: padding to lane-aligned shapes
# ----------------------------------------------------------------------------
def _round_up(n, m):
    return ((n + m - 1) // m) * m


def _pad_cast_bf16(w, rows, cols):
    r, c = w.shape
    if r != rows or c != cols:
        w = jnp.pad(w, ((0, rows - r), (0, cols - c)))
    return w.astype(jnp.bfloat16)


# ----------------------------------------------------------------------------
# MVNet forward (negative=False branch)
# ----------------------------------------------------------------------------
def mvnet_forward(params, x, *, block_batch=1024):
    B, input_dim = x.shape
    mid_dim = params["projector"][2].shape[1]

    # Lane-aligned (multiple-of-128) feature dims. 128 is the right target even
    # on the 256-wide MXUs (v6e/v7x): padding further adds DMA with no benefit.
    d_in = _round_up(input_dim, 128)
    d_mid = _round_up(mid_dim, 128)
    d_rh = _round_up(200, 128)          # recover hidden dim 200 -> 256
    d_out = 2 * d_in + d_mid            # fused output slab width

    wi1, wi2, wi3 = params["imputer"]
    wp1, wp2, wp3 = params["projector"]
    wr1, wr2 = params["recover"]

    # Weights: zero-pad to lane-aligned shapes, store as bf16 (MXU operands).
    weights = (
        _pad_cast_bf16(wi1, d_in, 512), _pad_cast_bf16(wi2, 512, 512),
        _pad_cast_bf16(wi3, 512, d_in),
        _pad_cast_bf16(wp1, d_in, 512), _pad_cast_bf16(wp2, 512, 256),
        _pad_cast_bf16(wp3, 256, d_mid),
        _pad_cast_bf16(wr1, d_mid, d_rh), _pad_cast_bf16(wr2, d_rh, d_in),
    )
    weight_elems = sum(int(w.size) for w in weights)

    # --- Batch tiling -------------------------------------------------------
    # Tile of up to `block_batch` rows (multiple of 8).  When the batch would
    # fit in a single tile, split it in two so v7x's two TensorCores both get a
    # grid entry (harmless on single-TC v5e/v6e).
    tb_cap = _round_up(min(max(B, 8), block_batch), 8)
    if B > 8:
        tb = min(tb_cap, _round_up(-(-B // 2), 8))
    else:
        tb = tb_cap
    b_pad = _round_up(B, tb)
    grid = (b_pad // tb,)

    xp = jnp.pad(x, ((0, b_pad - B), (0, d_in - input_dim)))

    # --- VMEM budget (explicit; v5e scoped default is only 16 MiB) ----------
    vmem_est = (
        2 * 2 * weight_elems            # bf16 weights, double-buffered
        + 2 * 4 * tb * d_in             # input tile (f32), double-buffered
        + 2 * 4 * tb * d_out            # fused output tile (f32), double-buffered
        + 8 * 4 * tb * 512              # in-kernel activation headroom
        + (4 << 20)                     # margin
    )
    # Floor 40 MiB (plenty of slack), cap 48 MiB (safe under v7x's 64 MiB phys).
    vmem_limit = int(min(max(vmem_est, 40 << 20), 48 << 20))

    # --- Advisory cost estimate (padded work, bf16 weights) -----------------
    flops = 2 * b_pad * weight_elems
    bytes_accessed = 4 * xp.size + 2 * weight_elems + 4 * b_pad * d_out

    # --- Kernel (closure over the static column offsets) --------------------
    def kernel(x_ref,
               wi1_ref, wi2_ref, wi3_ref,
               wp1_ref, wp2_ref, wp3_ref,
               wr1_ref, wr2_ref,
               out_ref):
        f32 = jnp.float32
        bf16 = jnp.bfloat16

        x_bf = x_ref[...].astype(bf16)

        # Imputer: d_in -> 512 -> 512 -> d_in
        h = _leaky_relu(jnp.dot(x_bf, wi1_ref[...], preferred_element_type=f32))
        h = _leaky_relu(jnp.dot(h.astype(bf16), wi2_ref[...],
                                preferred_element_type=f32))
        imputed = jnp.dot(h.astype(bf16), wi3_ref[...],
                          preferred_element_type=f32)
        out_ref[:, 0:d_in] = imputed

        # Projector: d_in -> 512 -> 256 -> d_mid
        h = _leaky_relu(jnp.dot(imputed.astype(bf16), wp1_ref[...],
                                preferred_element_type=f32))
        h = _leaky_relu(jnp.dot(h.astype(bf16), wp2_ref[...],
                                preferred_element_type=f32))
        mid = jnp.dot(h.astype(bf16), wp3_ref[...], preferred_element_type=f32)
        out_ref[:, d_in:d_in + d_mid] = mid

        # Recover: d_mid -> 256(=padded 200) -> d_in
        h = _leaky_relu(jnp.dot(mid.astype(bf16), wr1_ref[...],
                                preferred_element_type=f32))
        out_ref[:, d_in + d_mid:d_out] = jnp.dot(
            h.astype(bf16), wr2_ref[...], preferred_element_type=f32)

    in_specs = [pl.BlockSpec((tb, d_in), lambda i: (i, 0))] + [
        # Constant index_map -> weights DMA'd once, resident across batch tiles.
        pl.BlockSpec(w.shape, lambda i: (0, 0)) for w in weights
    ]
    out_specs = pl.BlockSpec((tb, d_out), lambda i: (i, 0))
    out_shape = jax.ShapeDtypeStruct((b_pad, d_out), jnp.float32)

    fused = pl.pallas_call(
        kernel,
        grid=grid,
        in_specs=in_specs,
        out_specs=out_specs,
        out_shape=out_shape,
        compiler_params=pltpu.CompilerParams(
            dimension_semantics=("parallel",),
            vmem_limit_bytes=vmem_limit),
        cost_estimate=pl.CostEstimate(
            flops=flops, transcendentals=0, bytes_accessed=bytes_accessed),
    )(xp, *weights)

    imputed = fused[:B, :input_dim]
    mid = fused[:B, d_in:d_in + mid_dim]
    recovered = fused[:B, d_in + d_mid:d_in + d_mid + input_dim]
    return imputed, mid, recovered
    # TODO(synk): negative=True branch requires get_missing_data (host-side
    # random masking + CPU<->device transfer) which has no Pallas equivalent.


# ----------------------------------------------------------------------------
# Parameter construction (deterministic, PyTorch-like init, stored [in, out]).
# All Linear layers in the PyTorch spec are bias=False, so no bias params.
# ----------------------------------------------------------------------------
def _init_linear(key, in_dim, out_dim):
    bound = 1.0 / jnp.sqrt(jnp.float32(in_dim))
    return jax.random.uniform(
        key, (in_dim, out_dim), dtype=jnp.float32, minval=-bound, maxval=bound
    )


def init_mvnet_params(key, input_dim, mid_dim):
    keys = jax.random.split(key, 8)
    return {
        # Imputer: input_dim -> 512 -> 512 -> input_dim
        "imputer": (
            _init_linear(keys[0], input_dim, 512),
            _init_linear(keys[1], 512, 512),
            _init_linear(keys[2], 512, input_dim),
        ),
        # Projector: input_dim -> 512 -> 256 -> mid_dim
        "projector": (
            _init_linear(keys[3], input_dim, 512),
            _init_linear(keys[4], 512, 256),
            _init_linear(keys[5], 256, mid_dim),
        ),
        # Recover: mid_dim -> 200 -> input_dim
        "recover": (
            _init_linear(keys[6], mid_dim, 200),
            _init_linear(keys[7], 200, input_dim),
        ),
    }


# ----------------------------------------------------------------------------
# Pure-JAX f32 reference (unpadded) for a correctness spot-check
# ----------------------------------------------------------------------------
def _ref_forward(params, x):
    def mlp(ws, h):
        for w in ws[:-1]:
            h = jnp.dot(h, w, preferred_element_type=jnp.float32)
            h = jnp.where(h > 0, h, LEAKY_SLOPE * h)
        return jnp.dot(h, ws[-1], preferred_element_type=jnp.float32)

    imp = mlp(params["imputer"], x)
    mid = mlp(params["projector"], imp)
    rec = mlp(params["recover"], mid)
    return imp, mid, rec


if __name__ == "__main__":
    input_dim = 32
    mid_dim = 16
    batch = 8

    key = jax.random.PRNGKey(0)
    k_params, k_x = jax.random.split(key)

    params = init_mvnet_params(k_params, input_dim, mid_dim)
    x = jax.random.normal(k_x, (batch, input_dim), dtype=jnp.float32)

    imputed, mid, recovered = jax.jit(mvnet_forward)(params, x)
    jax.block_until_ready((imputed, mid, recovered))

    assert imputed.shape == (batch, input_dim)
    assert mid.shape == (batch, mid_dim)
    assert recovered.shape == (batch, input_dim)

    # Check fused+padded bf16-MXU kernel against the plain f32 JAX forward.
    ref_imp, ref_mid, ref_rec = _ref_forward(params, x)
    assert jnp.allclose(imputed, ref_imp, rtol=1e-2, atol=1e-2)
    assert jnp.allclose(mid, ref_mid, rtol=1e-2, atol=1e-2)
    assert jnp.allclose(recovered, ref_rec, rtol=1e-2, atol=1e-2)

    print("KERNEL_OK")
</pallas_src>

<mosaic_0001>
module attributes {stable_mosaic.version = 11 : i64} {
  func.func @kernel(%arg0: i32, %arg1: memref<8x128xf32, #tpu.memory_space<vmem>>, %arg2: memref<128x512xbf16, #tpu.memory_space<vmem>>, %arg3: memref<512x512xbf16, #tpu.memory_space<vmem>>, %arg4: memref<512x128xbf16, #tpu.memory_space<vmem>>, %arg5: memref<128x512xbf16, #tpu.memory_space<vmem>>, %arg6: memref<512x256xbf16, #tpu.memory_space<vmem>>, %arg7: memref<256x128xbf16, #tpu.memory_space<vmem>>, %arg8: memref<128x256xbf16, #tpu.memory_space<vmem>>, %arg9: memref<256x128xbf16, #tpu.memory_space<vmem>>, %arg10: memref<8x384xf32, #tpu.memory_space<vmem>>) attributes {dimension_semantics = [#tpu.dimension_semantics<parallel>], iteration_bounds = array<i64: 1>, scalar_prefetch = 0 : i64, scratch_operands = 0 : i64, tpu.core_type = #tpu.core_type<tc>, window_params = [{transform_indices = @transform_0, window_bounds = array<i64: 8, 128>}, {pipeline_mode = #tpu.pipeline_mode<synchronous>, transform_indices = @transform_1, window_bounds = array<i64: 128, 512>}, {pipeline_mode = #tpu.pipeline_mode<synchronous>, transform_indices = @transform_2, window_bounds = array<i64: 512, 512>}, {pipeline_mode = #tpu.pipeline_mode<synchronous>, transform_indices = @transform_3, window_bounds = array<i64: 512, 128>}, {pipeline_mode = #tpu.pipeline_mode<synchronous>, transform_indices = @transform_4, window_bounds = array<i64: 128, 512>}, {pipeline_mode = #tpu.pipeline_mode<synchronous>, transform_indices = @transform_5, window_bounds = array<i64: 512, 256>}, {pipeline_mode = #tpu.pipeline_mode<synchronous>, transform_indices = @transform_6, window_bounds = array<i64: 256, 128>}, {pipeline_mode = #tpu.pipeline_mode<synchronous>, transform_indices = @transform_7, window_bounds = array<i64: 128, 256>}, {pipeline_mode = #tpu.pipeline_mode<synchronous>, transform_indices = @transform_8, window_bounds = array<i64: 256, 128>}, {transform_indices = @transform_9, window_bounds = array<i64: 8, 384>}]} {
    %c0 = arith.constant 0 : index
    %c0_0 = arith.constant 0 : index
    %0 = vector.load %arg1[%c0, %c0_0] : memref<8x128xf32, #tpu.memory_space<vmem>>, vector<8x128xf32>
    %1 = arith.truncf %0 : vector<8x128xf32> to vector<8x128xbf16>
    %c0_1 = arith.constant 0 : index
    %c0_2 = arith.constant 0 : index
    %2 = vector.load %arg2[%c0_1, %c0_2] : memref<128x512xbf16, #tpu.memory_space<vmem>>, vector<128x512xbf16>
    %cst = arith.constant dense<0.000000e+00> : vector<8x512xf32>
    %3 = tpu.matmul %1, %2, %cst {dimension_numbers = #tpu.dot_dimension_numbers<[1], [0], [0], [1], [0, 0, 1, 1], [], []>} : vector<8x128xbf16>, vector<128x512xbf16>, vector<8x512xf32> -> vector<8x512xf32>
    %cst_3 = arith.constant 0.000000e+00 : f32
    %4 = vector.broadcast %cst_3 : f32 to vector<8x512xf32>
    %5 = arith.cmpf ogt, %3, %4 : vector<8x512xf32>
    %cst_4 = arith.constant 0.00999999977 : f32
    %6 = vector.broadcast %cst_4 : f32 to vector<8x512xf32>
    %7 = arith.mulf %6, %3 : vector<8x512xf32>
    %8 = arith.select %5, %3, %7 : vector<8x512xi1>, vector<8x512xf32>
    %9 = arith.truncf %8 : vector<8x512xf32> to vector<8x512xbf16>
    %c0_5 = arith.constant 0 : index
    %c0_6 = arith.constant 0 : index
    %10 = vector.load %arg3[%c0_5, %c0_6] : memref<512x512xbf16, #tpu.memory_space<vmem>>, vector<512x512xbf16>
    %cst_7 = arith.constant dense<0.000000e+00> : vector<8x512xf32>
    %11 = tpu.matmul %9, %10, %cst_7 {dimension_numbers = #tpu.dot_dimension_numbers<[1], [0], [0], [1], [0, 0, 1, 1], [], []>} : vector<8x512xbf16>, vector<512x512xbf16>, vector<8x512xf32> -> vector<8x512xf32>
    %cst_8 = arith.constant 0.000000e+00 : f32
    %12 = vector.broadcast %cst_8 : f32 to vector<8x512xf32>
    %13 = arith.cmpf ogt, %11, %12 : vector<8x512xf32>
    %cst_9 = arith.constant 0.00999999977 : f32
    %14 = vector.broadcast %cst_9 : f32 to vector<8x512xf32>
    %15 = arith.mulf %14, %11 : vector<8x512xf32>
    %16 = arith.select %13, %11, %15 : vector<8x512xi1>, vector<8x512xf32>
    %17 = arith.truncf %16 : vector<8x512xf32> to vector<8x512xbf16>
    %c0_10 = arith.constant 0 : index
    %c0_11 = arith.constant 0 : index
    %18 = vector.load %arg4[%c0_10, %c0_11] : memref<512x128xbf16, #tpu.memory_space<vmem>>, vector<512x128xbf16>
    %cst_12 = arith.constant dense<0.000000e+00> : vector<8x128xf32>
    %19 = tpu.matmul %17, %18, %cst_12 {dimension_numbers = #tpu.dot_dimension_numbers<[1], [0], [0], [1], [0, 0, 1, 1], [], []>} : vector<8x512xbf16>, vector<512x128xbf16>, vector<8x128xf32> -> vector<8x128xf32>
    %c0_13 = arith.constant 0 : index
    %c0_14 = arith.constant 0 : index
    %20 = vector.load %arg10[%c0_13, %c0_14] : memref<8x384xf32, #tpu.memory_space<vmem>>, vector<8x128xf32>
    tpu.vector_store %arg10[%c0_13, %c0_14], %19 {strides = array<i32>} : memref<8x384xf32, #tpu.memory_space<vmem>>, vector<8x128xf32>,
    %21 = arith.truncf %19 : vector<8x128xf32> to vector<8x128xbf16>
    %c0_15 = arith.constant 0 : index
    %c0_16 = arith.constant 0 : index
    %22 = vector.load %arg5[%c0_15, %c0_16] : memref<128x512xbf16, #tpu.memory_space<vmem>>, vector<128x512xbf16>
    %cst_17 = arith.constant dense<0.000000e+00> : vector<8x512xf32>
    %23 = tpu.matmul %21, %22, %cst_17 {dimension_numbers = #tpu.dot_dimension_numbers<[1], [0], [0], [1], [0, 0, 1, 1], [], []>} : vector<8x128xbf16>, vector<128x512xbf16>, vector<8x512xf32> -> vector<8x512xf32>
    %cst_18 = arith.constant 0.000000e+00 : f32
    %24 = vector.broadcast %cst_18 : f32 to vector<8x512xf32>
    %25 = arith.cmpf ogt, %23, %24 : vector<8x512xf32>
    %cst_19 = arith.constant 0.00999999977 : f32
    %26 = vector.broadcast %cst_19 : f32 to vector<8x512xf32>
    %27 = arith.mulf %26, %23 : vector<8x512xf32>
    %28 = arith.select %25, %23, %27 : vector<8x512xi1>, vector<8x512xf32>
    %29 = arith.truncf %28 : vector<8x512xf32> to vector<8x512xbf16>
    %c0_20 = arith.constant 0 : index
    %c0_21 = arith.constant 0 : index
    %30 = vector.load %arg6[%c0_20, %c0_21] : memref<512x256xbf16, #tpu.memory_space<vmem>>, vector<512x256xbf16>
    %cst_22 = arith.constant dense<0.000000e+00> : vector<8x256xf32>
    %31 = tpu.matmul %29, %30, %cst_22 {dimension_numbers = #tpu.dot_dimension_numbers<[1], [0], [0], [1], [0, 0, 1, 1], [], []>} : vector<8x512xbf16>, vector<512x256xbf16>, vector<8x256xf32> -> vector<8x256xf32>
    %cst_23 = arith.constant 0.000000e+00 : f32
    %32 = vector.broadcast %cst_23 : f32 to vector<8x256xf32>
    %33 = arith.cmpf ogt, %31, %32 : vector<8x256xf32>
    %cst_24 = arith.constant 0.00999999977 : f32
    %34 = vector.broadcast %cst_24 : f32 to vector<8x256xf32>
    %35 = arith.mulf %34, %31 : vector<8x256xf32>
    %36 = arith.select %33, %31, %35 : vector<8x256xi1>, vector<8x256xf32>
    %37 = arith.truncf %36 : vector<8x256xf32> to vector<8x256xbf16>
    %c0_25 = arith.constant 0 : index
    %c0_26 = arith.constant 0 : index
    %38 = vector.load %arg7[%c0_25, %c0_26] : memref<256x128xbf16, #tpu.memory_space<vmem>>, vector<256x128xbf16>
    %cst_27 = arith.constant dense<0.000000e+00> : vector<8x128xf32>
    %39 = tpu.matmul %37, %38, %cst_27 {dimension_numbers = #tpu.dot_dimension_numbers<[1], [0], [0], [1], [0, 0, 1, 1], [], []>} : vector<8x256xbf16>, vector<256x128xbf16>, vector<8x128xf32> -> vector<8x128xf32>
    %c0_28 = arith.constant 0 : index
    %c128 = arith.constant 128 : index
    %40 = vector.load %arg10[%c0_28, %c128] : memref<8x384xf32, #tpu.memory_space<vmem>>, vector<8x128xf32>
    tpu.vector_store %arg10[%c0_28, %c128], %39 {strides = array<i32>} : memref<8x384xf32, #tpu.memory_space<vmem>>, vector<8x128xf32>,
    %41 = arith.truncf %39 : vector<8x128xf32> to vector<8x128xbf16>
    %c0_29 = arith.constant 0 : index
    %c0_30 = arith.constant 0 : index
    %42 = vector.load %arg8[%c0_29, %c0_30] : memref<128x256xbf16, #tpu.memory_space<vmem>>, vector<128x256xbf16>
    %cst_31 = arith.constant dense<0.000000e+00> : vector<8x256xf32>
    %43 = tpu.matmul %41, %42, %cst_31 {dimension_numbers = #tpu.dot_dimension_numbers<[1], [0], [0], [1], [0, 0, 1, 1], [], []>} : vector<8x128xbf16>, vector<128x256xbf16>, vector<8x256xf32> -> vector<8x256xf32>
    %cst_32 = arith.constant 0.000000e+00 : f32
    %44 = vector.broadcast %cst_32 : f32 to vector<8x256xf32>
    %45 = arith.cmpf ogt, %43, %44 : vector<8x256xf32>
    %cst_33 = arith.constant 0.00999999977 : f32
    %46 = vector.broadcast %cst_33 : f32 to vector<8x256xf32>
    %47 = arith.mulf %46, %43 : vector<8x256xf32>
    %48 = arith.select %45, %43, %47 : vector<8x256xi1>, vector<8x256xf32>
    %49 = arith.truncf %48 : vector<8x256xf32> to vector<8x256xbf16>
    %c0_34 = arith.constant 0 : index
    %c0_35 = arith.constant 0 : index
    %50 = vector.load %arg9[%c0_34, %c0_35] : memref<256x128xbf16, #tpu.memory_space<vmem>>, vector<256x128xbf16>
    %cst_36 = arith.constant dense<0.000000e+00> : vector<8x128xf32>
    %51 = tpu.matmul %49, %50, %cst_36 {dimension_numbers = #tpu.dot_dimension_numbers<[1], [0], [0], [1], [0, 0, 1, 1], [], []>} : vector<8x256xbf16>, vector<256x128xbf16>, vector<8x128xf32> -> vector<8x128xf32>
    %c0_37 = arith.constant 0 : index
    %c256 = arith.constant 256 : index
    %52 = vector.load %arg10[%c0_37, %c256] : memref<8x384xf32, #tpu.memory_space<vmem>>, vector<8x128xf32>
    tpu.vector_store %arg10[%c0_37, %c256], %51 {strides = array<i32>} : memref<8x384xf32, #tpu.memory_space<vmem>>, vector<8x128xf32>,
    return
  }
  func.func @transform_0(%arg0: i32) -> (i32, i32) {
    %c0_i32 = arith.constant 0 : i32
    %c0_i32_0 = arith.constant 0 : i32
    return %arg0, %c0_i32 : i32, i32
  }
  func.func @transform_1(%arg0: i32) -> (i32, i32) {
    %c0_i32 = arith.constant 0 : i32
    %c0_i32_0 = arith.constant 0 : i32
    %c0_i32_1 = arith.constant 0 : i32
    return %c0_i32, %c0_i32_0 : i32, i32
  }
  func.func @transform_2(%arg0: i32) -> (i32, i32) {
    %c0_i32 = arith.constant 0 : i32
    %c0_i32_0 = arith.constant 0 : i32
    %c0_i32_1 = arith.constant 0 : i32
    return %c0_i32, %c0_i32_0 : i32, i32
  }
  func.func @transform_3(%arg0: i32) -> (i32, i32) {
    %c0_i32 = arith.constant 0 : i32
    %c0_i32_0 = arith.constant 0 : i32
    %c0_i32_1 = arith.constant 0 : i32
    return %c0_i32, %c0_i32_0 : i32, i32
  }
  func.func @transform_4(%arg0: i32) -> (i32, i32) {
    %c0_i32 = arith.constant 0 : i32
    %c0_i32_0 = arith.constant 0 : i32
    %c0_i32_1 = arith.constant 0 : i32
    return %c0_i32, %c0_i32_0 : i32, i32
  }
  func.func @transform_5(%arg0: i32) -> (i32, i32) {
    %c0_i32 = arith.constant 0 : i32
    %c0_i32_0 = arith.constant 0 : i32
    %c0_i32_1 = arith.constant 0 : i32
    return %c0_i32, %c0_i32_0 : i32, i32
  }
  func.func @transform_6(%arg0: i32) -> (i32, i32) {
    %c0_i32 = arith.constant 0 : i32
    %c0_i32_0 = arith.constant 0 : i32
    %c0_i32_1 = arith.constant 0 : i32
    return %c0_i32, %c0_i32_0 : i32, i32
  }
  func.func @transform_7(%arg0: i32) -> (i32, i32) {
    %c0_i32 = arith.constant 0 : i32
    %c0_i32_0 = arith.constant 0 : i32
    %c0_i32_1 = arith.constant 0 : i32
    return %c0_i32, %c0_i32_0 : i32, i32
  }
  func.func @transform_8(%arg0: i32) -> (i32, i32) {
    %c0_i32 = arith.constant 0 : i32
    %c0_i32_0 = arith.constant 0 : i32
    %c0_i32_1 = arith.constant 0 : i32
    return %c0_i32, %c0_i32_0 : i32, i32
  }
  func.func @transform_9(%arg0: i32) -> (i32, i32) {
    %c0_i32 = arith.constant 0 : i32
    %c0_i32_0 = arith.constant 0 : i32
    return %arg0, %c0_i32 : i32, i32
  }
}

</mosaic_0001>

<bundles_post_ra>
// kernel: mvnet_forward.1
= control target key start
LH: loop header
LB: loop body
LE: loop exit
PB: predicated region body
PF: predicated region fallthrough
CT: control target
= control target key end

     0   :  { %v3772_v1 = vmov 0   ;;  %s4858_s1 = inlined_call_operand.vmem [shape: bf16[128,512], index: 1, kind: input, shape index: {}]   ;;  %s4859_s2 = inlined_call_operand.vmem [shape: bf16[512,512], index: 2, kind: input, shape index: {}]   ;;  %s4860_s0 = inlined_call_operand.vmem [shape: f32[8,128], index: 0, kind: input, shape index: {}]   ;;  %s4861_s3 = inlined_call_operand.vmem [shape: bf16[512,128], index: 3, kind: input, shape index: {}]   ;;  %s4862_s4 = inlined_call_operand.vmem [shape: bf16[128,512], index: 4, kind: input, shape index: {}]   ;;  %s4863_s5 = inlined_call_operand.vmem [shape: bf16[512,256], index: 5, kind: input, shape index: {}]   ;;  %s4864_s9 = inlined_call_operand.vmem [shape: f32[8,384], index: 9, kind: output, shape index: {}]   ;;  %s4865_s6 = inlined_call_operand.vmem [shape: bf16[256,128], index: 6, kind: input, shape index: {}]   ;;  %s4866_s7 = inlined_call_operand.vmem [shape: bf16[128,256], index: 7, kind: input, shape index: {}]   ;;  %s4867_s8 = inlined_call_operand.vmem [shape: bf16[256,128], index: 8, kind: input, shape index: {}]  }
   0x1   :  { %v3300_v0 = vld [vmem:[%s4858_s1 + $0x4] ss:$16 sps:$4 sm:$0xff]   ;;  %259 = vmatprep.mubr.bf16.mxu0 %v3772_v1  ;;  %300 = vmatprep.mubr.bf16.mxu1 %v3772_v1  ;;  %v3302_v2 = vld [vmem:[%s4858_s1] ss:$16 sps:$4 sm:$0xff]   ;;  %v3324_v10 = vld [vmem:[%s4858_s1 + $0xc] ss:$16 sps:$4 sm:$0xff]  }
   0x2   :  { %227 = vmatprep.subr.bf16.mxu0 %v3300_v0  ;;  %v3303_v3 = vld [vmem:[%s4858_s1 + $0x24] ss:$16 sps:$4 sm:$0xff]   ;;  %v3305_v4 = vld [vmem:[%s4858_s1 + $0x20] ss:$16 sps:$4 sm:$0xff]   ;;  %v3326_v11 = vld [vmem:[%s4858_s1 + $0x8] ss:$16 sps:$4 sm:$0xff]   ;;  %268 = vmatprep.subr.bf16.mxu1 %v3324_v10 }
   0x3   :  { %228 = vmatpush1.bf16.msra.mxu0 %v3302_v2  ;;  %v3306_v5 = vld [vmem:[%s4858_s1 + $0x44] ss:$16 sps:$4 sm:$0xff]   ;;  %v3308_v6 = vld [vmem:[%s4858_s1 + $0x40] ss:$16 sps:$4 sm:$0xff]   ;;  %v3327_v12 = vld [vmem:[%s4858_s1 + $0x2c] ss:$16 sps:$4 sm:$0xff]   ;;  %269 = vmatpush1.bf16.msra.mxu1 %v3326_v11 }
   0x4   :  { %229 = vmatprep.subr.bf16.mxu0 %v3303_v3  ;;  %v3309_v7 = vld [vmem:[%s4858_s1 + $0x64] ss:$16 sps:$4 sm:$0xff]   ;;  %v3311_v8 = vld [vmem:[%s4858_s1 + $0x60] ss:$16 sps:$4 sm:$0xff]   ;;  %v3329_v14 = vld [vmem:[%s4858_s1 + $0x28] ss:$16 sps:$4 sm:$0xff]   ;;  %270 = vmatprep.subr.bf16.mxu1 %v3327_v12 }
   0x5   :  { %v3312_v9 = vld [vmem:[%s4858_s1 + $0x84] ss:$16 sps:$4 sm:$0xff]   ;;  %v3314_v13 = vld [vmem:[%s4858_s1 + $0x80] ss:$16 sps:$4 sm:$0xff]   ;;  %v3330_v15 = vld [vmem:[%s4858_s1 + $0x4c] ss:$16 sps:$4 sm:$0xff]  }
   0x6   :  { %v3315_v16 = vld [vmem:[%s4858_s1 + $0xa4] ss:$16 sps:$4 sm:$0xff]   ;;  %v3317_v17 = vld [vmem:[%s4858_s1 + $0xa0] ss:$16 sps:$4 sm:$0xff]   ;;  %v3332_v18 = vld [vmem:[%s4858_s1 + $0x48] ss:$16 sps:$4 sm:$0xff]  }
   0x7   :  { %230 = vmatpush1.bf16.msra.mxu0 %v3305_v4  ;;  %271 = vmatpush1.bf16.msra.mxu1 %v3329_v14  ;;  %v3333_v19 = vld [vmem:[%s4858_s1 + $0x6c] ss:$16 sps:$4 sm:$0xff]   ;;  %v3318_v20 = vld [vmem:[%s4858_s1 + $0xc4] ss:$16 sps:$4 sm:$0xff]   ;;  %v3320_v21 = vld [vmem:[%s4858_s1 + $0xc0] ss:$16 sps:$4 sm:$0xff]  }
   0x8   :  { %231 = vmatprep.subr.bf16.mxu0 %v3306_v5  ;;  %272 = vmatprep.subr.bf16.mxu1 %v3330_v15  ;;  %v3335_v22 = vld [vmem:[%s4858_s1 + $0x68] ss:$16 sps:$4 sm:$0xff]   ;;  %v3336_v23 = vld [vmem:[%s4858_s1 + $0x8c] ss:$16 sps:$4 sm:$0xff]   ;;  %v3321_v24 = vld [vmem:[%s4858_s1 + $0xe4] ss:$16 sps:$4 sm:$0xff]  }
   0x9   :  { %v3323_v25 = vld [vmem:[%s4858_s1 + $0xe0] ss:$16 sps:$4 sm:$0xff]   ;;  %v3338_v27 = vld [vmem:[%s4858_s1 + $0x88] ss:$16 sps:$4 sm:$0xff]   ;;  %v3339_v28 = vld [vmem:[%s4858_s1 + $0xac] ss:$16 sps:$4 sm:$0xff]  }
   0xa   :  { %v33_v26 = vld [vmem:[%s4860_s0] sm:$0xff]  ;;  %v3341_v31 = vld [vmem:[%s4858_s1 + $0xa8] ss:$16 sps:$4 sm:$0xff]   ;;  %v3342_v32 = vld [vmem:[%s4858_s1 + $0xcc] ss:$16 sps:$4 sm:$0xff]  }
   0xb   :  { %232 = vmatpush1.bf16.msra.mxu0 %v3308_v6  ;;  %273 = vmatpush1.bf16.msra.mxu1 %v3332_v18  ;;  %v3350_v29 = vld [vmem:[%s4859_s2 + $0x4] ss:$16 sps:$4 sm:$0xff]   ;;  %v34_v30 = vpack.c.bf16 %v33_v26, %v33_v26  ;;  %v3348_v33 = vld [vmem:[%s4859_s2] ss:$16 sps:$4 sm:$0xff]   ;;  %v3344_v35 = vld [vmem:[%s4858_s1 + $0xc8] ss:$16 sps:$4 sm:$0xff]  }
   0xc   :  { %233 = vmatprep.subr.bf16.mxu0 %v3309_v7  ;;  %274 = vmatprep.subr.bf16.mxu1 %v3333_v19  ;;  %v3356_v34 = vld [vmem:[%s4859_s2 + $0x24] ss:$16 sps:$4 sm:$0xff]   ;;  %v3345_v36 = vld [vmem:[%s4858_s1 + $0xec] ss:$16 sps:$4 sm:$0xff]   ;;  %v3354_v37 = vld [vmem:[%s4859_s2 + $0x20] ss:$16 sps:$4 sm:$0xff]  }
   0xd   :  { %v3362_v38 = vld [vmem:[%s4859_s2 + $0x44] ss:$16 sps:$4 sm:$0xff]   ;;  %v3347_v39 = vld [vmem:[%s4858_s1 + $0xe8] ss:$16 sps:$4 sm:$0xff]   ;;  %v3353_v40 = vld [vmem:[%s4859_s2 + $0xc] ss:$16 sps:$4 sm:$0xff]  }
   0xe   :  { %v3360_v41 = vld [vmem:[%s4859_s2 + $0x40] ss:$16 sps:$4 sm:$0xff]   ;;  %v3368_v42 = vld [vmem:[%s4859_s2 + $0x64] ss:$16 sps:$4 sm:$0xff]   ;;  %v3351_v43 = vld [vmem:[%s4859_s2 + $0x8] ss:$16 sps:$4 sm:$0xff]  }
   0xf   :  { %234 = vmatpush1.bf16.msra.mxu0 %v3311_v8  ;;  %275 = vmatpush1.bf16.msra.mxu1 %v3335_v22  ;;  %v3359_v44 = vld [vmem:[%s4859_s2 + $0x2c] ss:$16 sps:$4 sm:$0xff]   ;;  %v3366_v45 = vld [vmem:[%s4859_s2 + $0x60] ss:$16 sps:$4 sm:$0xff]   ;;  %v3374_v46 = vld [vmem:[%s4859_s2 + $0x84] ss:$16 sps:$4 sm:$0xff]  }
  0x10   :  { %235 = vmatprep.subr.bf16.mxu0 %v3312_v9  ;;  %276 = vmatprep.subr.bf16.mxu1 %v3336_v23  ;;  %v3357_v47 = vld [vmem:[%s4859_s2 + $0x28] ss:$16 sps:$4 sm:$0xff]   ;;  %v3365_v48 = vld [vmem:[%s4859_s2 + $0x4c] ss:$16 sps:$4 sm:$0xff]   ;;  %v3372_v49 = vld [vmem:[%s4859_s2 + $0x80] ss:$16 sps:$4 sm:$0xff]  }
  0x11   :  { %v3380_v50 = vld [vmem:[%s4859_s2 + $0xa4] ss:$16 sps:$4 sm:$0xff]   ;;  %v3363_v51 = vld [vmem:[%s4859_s2 + $0x48] ss:$16 sps:$4 sm:$0xff]   ;;  %v3371_v52 = vld [vmem:[%s4859_s2 + $0x6c] ss:$16 sps:$4 sm:$0xff]  }
  0x12   :  { %v3378_v53 = vld [vmem:[%s4859_s2 + $0xa0] ss:$16 sps:$4 sm:$0xff]   ;;  %v3386_v54 = vld [vmem:[%s4859_s2 + $0xc4] ss:$16 sps:$4 sm:$0xff]   ;;  %v3369_v55 = vld [vmem:[%s4859_s2 + $0x68] ss:$16 sps:$4 sm:$0xff]  }
  0x13   :  { %236 = vmatpush1.bf16.msra.mxu0 %v3314_v13  ;;  %277 = vmatpush1.bf16.msra.mxu1 %v3338_v27  ;;  %v3377_v56 = vld [vmem:[%s4859_s2 + $0x8c] ss:$16 sps:$4 sm:$0xff]   ;;  %v3384_v57 = vld [vmem:[%s4859_s2 + $0xc0] ss:$16 sps:$4 sm:$0xff]   ;;  %v3392_v58 = vld [vmem:[%s4859_s2 + $0xe4] ss:$16 sps:$4 sm:$0xff]  }
  0x14   :  { %237 = vmatprep.subr.bf16.mxu0 %v3315_v16  ;;  %278 = vmatprep.subr.bf16.mxu1 %v3339_v28  ;;  %v3375_v59 = vld [vmem:[%s4859_s2 + $0x88] ss:$16 sps:$4 sm:$0xff]   ;;  %v3383_v60 = vld [vmem:[%s4859_s2 + $0xac] ss:$16 sps:$4 sm:$0xff]   ;;  %v3390_v61 = vld [vmem:[%s4859_s2 + $0xe0] ss:$16 sps:$4 sm:$0xff]  }
  0x15   :  { %v3381_v62 = vld [vmem:[%s4859_s2 + $0xa8] ss:$16 sps:$4 sm:$0xff]   ;;  %v3398_v63 = vld [vmem:[%s4859_s2 + $0x104] ss:$16 sps:$4 sm:$0xff]   ;;  %v3389_v0 = vld [vmem:[%s4859_s2 + $0xcc] ss:$16 sps:$4 sm:$0xff]  }
  0x16   :  { %v3396_v2 = vld [vmem:[%s4859_s2 + $0x100] ss:$16 sps:$4 sm:$0xff]   ;;  %v3404_v3 = vld [vmem:[%s4859_s2 + $0x124] ss:$16 sps:$4 sm:$0xff]   ;;  %v3387_v4 = vld [vmem:[%s4859_s2 + $0xc8] ss:$16 sps:$4 sm:$0xff]  }
  0x17   :  { %238 = vmatpush1.bf16.msra.mxu0 %v3317_v17  ;;  %279 = vmatpush1.bf16.msra.mxu1 %v3341_v31  ;;  %v3395_v5 = vld [vmem:[%s4859_s2 + $0xec] ss:$16 sps:$4 sm:$0xff]   ;;  %v3402_v6 = vld [vmem:[%s4859_s2 + $0x120] ss:$16 sps:$4 sm:$0xff]   ;;  %v3410_v7 = vld [vmem:[%s4859_s2 + $0x144] ss:$16 sps:$4 sm:$0xff]  }
  0x18   :  { %239 = vmatprep.subr.bf16.mxu0 %v3318_v20  ;;  %280 = vmatprep.subr.bf16.mxu1 %v3342_v32  ;;  %v3393_v8 = vld [vmem:[%s4859_s2 + $0xe8] ss:$16 sps:$4 sm:$0xff]   ;;  %v3401_v9 = vld [vmem:[%s4859_s2 + $0x10c] ss:$16 sps:$4 sm:$0xff]   ;;  %v3408_v10 = vld [vmem:[%s4859_s2 + $0x140] ss:$16 sps:$4 sm:$0xff]  }
  0x19   :  { %v3416_v11 = vld [vmem:[%s4859_s2 + $0x164] ss:$16 sps:$4 sm:$0xff]   ;;  %v3399_v12 = vld [vmem:[%s4859_s2 + $0x108] ss:$16 sps:$4 sm:$0xff]   ;;  %v3407_v13 = vld [vmem:[%s4859_s2 + $0x12c] ss:$16 sps:$4 sm:$0xff]  }
  0x1a   :  { %v3414_v14 = vld [vmem:[%s4859_s2 + $0x160] ss:$16 sps:$4 sm:$0xff]   ;;  %v3422_v15 = vld [vmem:[%s4859_s2 + $0x184] ss:$16 sps:$4 sm:$0xff]   ;;  %v3405_v16 = vld [vmem:[%s4859_s2 + $0x128] ss:$16 sps:$4 sm:$0xff]  }
  0x1b   :  { %240 = vmatpush1.bf16.msra.mxu0 %v3320_v21  ;;  %281 = vmatpush1.bf16.msra.mxu1 %v3344_v35  ;;  %v3413_v17 = vld [vmem:[%s4859_s2 + $0x14c] ss:$16 sps:$4 sm:$0xff]   ;;  %v3420_v18 = vld [vmem:[%s4859_s2 + $0x180] ss:$16 sps:$4 sm:$0xff]   ;;  %v3428_v19 = vld [vmem:[%s4859_s2 + $0x1a4] ss:$16 sps:$4 sm:$0xff]  }
  0x1c   :  { %241 = vmatprep.subr.bf16.mxu0 %v3321_v24  ;;  %282 = vmatprep.subr.bf16.mxu1 %v3345_v36  ;;  %v3411_v20 = vld [vmem:[%s4859_s2 + $0x148] ss:$16 sps:$4 sm:$0xff]   ;;  %v3419_v21 = vld [vmem:[%s4859_s2 + $0x16c] ss:$16 sps:$4 sm:$0xff]   ;;  %v3426_v22 = vld [vmem:[%s4859_s2 + $0x1a0] ss:$16 sps:$4 sm:$0xff]  }
  0x1d   :  { %v3434_v23 = vld [vmem:[%s4859_s2 + $0x1c4] ss:$16 sps:$4 sm:$0xff]   ;;  %v3417_v24 = vld [vmem:[%s4859_s2 + $0x168] ss:$16 sps:$4 sm:$0xff]   ;;  %v3432_v26 = vld [vmem:[%s4859_s2 + $0x1c0] ss:$16 sps:$4 sm:$0xff]  }
  0x1e   :  { %v3423_v27 = vld [vmem:[%s4859_s2 + $0x188] ss:$16 sps:$4 sm:$0xff]   ;;  %v3431_v28 = vld [vmem:[%s4859_s2 + $0x1ac] ss:$16 sps:$4 sm:$0xff]   ;;  %v3440_v32 = vld [vmem:[%s4859_s2 + $0x1e4] ss:$16 sps:$4 sm:$0xff]  }
  0x1f   :  { %242 = vmatpush1.bf16.msra.mxu0 %v3323_v25  ;;  %283 = vmatpush1.bf16.msra.mxu1 %v3347_v39  ;;  %v3425_v25 = vld [vmem:[%s4859_s2 + $0x18c] ss:$16 sps:$4 sm:$0xff]   ;;  %v3435_v31 = vld [vmem:[%s4859_s2 + $0x1c8] ss:$16 sps:$4 sm:$0xff]   ;;  %v3446_v36 = vld [vmem:[%s4859_s2 + $0x204] ss:$16 sps:$4 sm:$0xff]  }
  0x20   :  { %1093 = vmatprep.subr.bf16.mxu0 %v3350_v29  ;;  %1175 = vmatprep.subr.bf16.mxu1 %v3353_v40  ;;  %v3429_v29 = vld [vmem:[%s4859_s2 + $0x1a8] ss:$16 sps:$4 sm:$0xff]  }
  0x21   :  { %v3441_v35 = vld [vmem:[%s4859_s2 + $0x1e8] ss:$16 sps:$4 sm:$0xff]  }
  0x22   :  { %260 = vmatmul.mubr.bf16.vlgmr.msra.gmra.mrb[0].mxu0 %v34_v30  ;;  %301 = vmatmul.mubr.bf16.vlgmr.msra.gmra.mrb[0].mxu1 %v34_v30  ;;  %v3437_v30 = vld [vmem:[%s4859_s2 + $0x1cc] ss:$16 sps:$4 sm:$0xff]  }
  0x23   :  { %1094 = vmatpush1.bf16.msra.mxu0 %v3348_v33  ;;  %1176 = vmatpush1.bf16.msra.mxu1 %v3351_v43  ;;  %v3443_v33 = vld [vmem:[%s4859_s2 + $0x1ec] ss:$16 sps:$4 sm:$0xff]  }
  0x24   :  { %1095 = vmatprep.subr.bf16.mxu0 %v3356_v34  ;;  %1177 = vmatprep.subr.bf16.mxu1 %v3359_v44  ;;  %v3438_v34 = vld [vmem:[%s4859_s2 + $0x1e0] ss:$16 sps:$4 sm:$0xff]  }
  0x27   :  { %1096 = vmatpush1.bf16.msra.mxu0 %v3354_v37  ;;  %1178 = vmatpush1.bf16.msra.mxu1 %v3357_v47  ;;  %v3449_v37 = vld [vmem:[%s4859_s2 + $0x20c] ss:$16 sps:$4 sm:$0xff]   ;;  %v3444_v47 = vld [vmem:[%s4859_s2 + $0x200] ss:$16 sps:$4 sm:$0xff]  }
  0x28   :  { %1097 = vmatprep.subr.bf16.mxu0 %v3362_v38  ;;  %1179 = vmatprep.subr.bf16.mxu1 %v3365_v48  ;;  %v3447_v48 = vld [vmem:[%s4859_s2 + $0x208] ss:$16 sps:$4 sm:$0xff]  }
  0x2b   :  { %1098 = vmatpush1.bf16.msra.mxu0 %v3360_v41  ;;  %1180 = vmatpush1.bf16.msra.mxu1 %v3363_v51  ;;  %v3455_v51 = vld [vmem:[%s4859_s2 + $0x22c] ss:$16 sps:$4 sm:$0xff]  }
  0x2c   :  { %1099 = vmatprep.subr.bf16.mxu0 %v3368_v42  ;;  %1181 = vmatprep.subr.bf16.mxu1 %v3371_v52  ;;  %v3450_v52 = vld [vmem:[%s4859_s2 + $0x220] ss:$16 sps:$4 sm:$0xff]  }
  0x2f   :  { %1100 = vmatpush1.bf16.msra.mxu0 %v3366_v45  ;;  %1182 = vmatpush1.bf16.msra.mxu1 %v3369_v55  ;;  %v3461_v55 = vld [vmem:[%s4859_s2 + $0x24c] ss:$16 sps:$4 sm:$0xff]  }
  0x30   :  { %1101 = vmatprep.subr.bf16.mxu0 %v3374_v46  ;;  %1183 = vmatprep.subr.bf16.mxu1 %v3377_v56 }
  0x33   :  { %1102 = vmatpush1.bf16.msra.mxu0 %v3372_v49  ;;  %1184 = vmatpush1.bf16.msra.mxu1 %v3375_v59  ;;  %v3459_v59 = vld [vmem:[%s4859_s2 + $0x248] ss:$16 sps:$4 sm:$0xff]  }
  0x34   :  { %1103 = vmatprep.subr.bf16.mxu0 %v3380_v50  ;;  %1185 = vmatprep.subr.bf16.mxu1 %v3383_v60  ;;  %v3452_v50 = vld [vmem:[%s4859_s2 + $0x224] ss:$16 sps:$4 sm:$0xff]  }
  0x37   :  { %1104 = vmatpush1.bf16.msra.mxu0 %v3378_v53  ;;  %1186 = vmatpush1.bf16.msra.mxu1 %v3381_v62  ;;  %v3453_v53 = vld [vmem:[%s4859_s2 + $0x228] ss:$16 sps:$4 sm:$0xff]   ;;  %v3464_v62 = vld [vmem:[%s4859_s2 + $0x264] ss:$16 sps:$4 sm:$0xff]  }
  0x38   :  { %1105 = vmatprep.subr.bf16.mxu0 %v3386_v54  ;;  %1187 = vmatprep.subr.bf16.mxu1 %v3389_v0  ;;  %v3458_v54 = vld [vmem:[%s4859_s2 + $0x244] ss:$16 sps:$4 sm:$0xff]  }
  0x3b   :  { %1106 = vmatpush1.bf16.msra.mxu0 %v3384_v57  ;;  %1188 = vmatpush1.bf16.msra.mxu1 %v3387_v4  ;;  %v3456_v57 = vld [vmem:[%s4859_s2 + $0x240] ss:$16 sps:$4 sm:$0xff]  }
  0x3c   :  { %1107 = vmatprep.subr.bf16.mxu0 %v3392_v58  ;;  %1189 = vmatprep.subr.bf16.mxu1 %v3395_v5  ;;  %v3462_v4 = vld [vmem:[%s4859_s2 + $0x260] ss:$16 sps:$4 sm:$0xff]   ;;  %v3465_v5 = vld [vmem:[%s4859_s2 + $0x268] ss:$16 sps:$4 sm:$0xff]  }
  0x3f   :  { %1108 = vmatpush1.bf16.msra.mxu0 %v3390_v61  ;;  %1190 = vmatpush1.bf16.msra.mxu1 %v3393_v8  ;;  %v3468_v8 = vld [vmem:[%s4859_s2 + $0x280] ss:$16 sps:$4 sm:$0xff]  }
  0x40   :  { %1109 = vmatprep.subr.bf16.mxu0 %v3398_v63  ;;  %1191 = vmatprep.subr.bf16.mxu1 %v3401_v9  ;;  %v3467_v63 = vld [vmem:[%s4859_s2 + $0x26c] ss:$16 sps:$4 sm:$0xff]   ;;  %v3471_v9 = vld [vmem:[%s4859_s2 + $0x288] ss:$16 sps:$4 sm:$0xff]  }
  0x43   :  { %1110 = vmatpush1.bf16.msra.mxu0 %v3396_v2  ;;  %1192 = vmatpush1.bf16.msra.mxu1 %v3399_v12  ;;  %v3474_v12 = vld [vmem:[%s4859_s2 + $0x2a0] ss:$16 sps:$4 sm:$0xff]  }
  0x44   :  { %1111 = vmatprep.subr.bf16.mxu0 %v3404_v3  ;;  %1193 = vmatprep.subr.bf16.mxu1 %v3407_v13  ;;  %v3477_v13 = vld [vmem:[%s4859_s2 + $0x2a8] ss:$16 sps:$4 sm:$0xff]  }
  0x47   :  { %1112 = vmatpush1.bf16.msra.mxu0 %v3402_v6  ;;  %1194 = vmatpush1.bf16.msra.mxu1 %v3405_v16  ;;  %v3470_v6 = vld [vmem:[%s4859_s2 + $0x284] ss:$16 sps:$4 sm:$0xff]   ;;  %v3480_v16 = vld [vmem:[%s4859_s2 + $0x2c0] ss:$16 sps:$4 sm:$0xff]  }
  0x48   :  { %1113 = vmatprep.subr.bf16.mxu0 %v3410_v7  ;;  %1195 = vmatprep.subr.bf16.mxu1 %v3413_v17  ;;  %v3473_v7 = vld [vmem:[%s4859_s2 + $0x28c] ss:$16 sps:$4 sm:$0xff]   ;;  %v3483_v17 = vld [vmem:[%s4859_s2 + $0x2c8] ss:$16 sps:$4 sm:$0xff]  }
  0x4b   :  { %1114 = vmatpush1.bf16.msra.mxu0 %v3408_v10  ;;  %1196 = vmatpush1.bf16.msra.mxu1 %v3411_v20  ;;  %v3476_v10 = vld [vmem:[%s4859_s2 + $0x2a4] ss:$16 sps:$4 sm:$0xff]   ;;  %v3486_v20 = vld [vmem:[%s4859_s2 + $0x2e0] ss:$16 sps:$4 sm:$0xff]  }
  0x4c   :  { %1115 = vmatprep.subr.bf16.mxu0 %v3416_v11  ;;  %1197 = vmatprep.subr.bf16.mxu1 %v3419_v21  ;;  %v3479_v11 = vld [vmem:[%s4859_s2 + $0x2ac] ss:$16 sps:$4 sm:$0xff]   ;;  %v3489_v21 = vld [vmem:[%s4859_s2 + $0x2e8] ss:$16 sps:$4 sm:$0xff]  }
  0x4f   :  { %1116 = vmatpush1.bf16.msra.mxu0 %v3414_v14  ;;  %1198 = vmatpush1.bf16.msra.mxu1 %v3417_v24  ;;  %v3482_v14 = vld [vmem:[%s4859_s2 + $0x2c4] ss:$16 sps:$4 sm:$0xff]   ;;  %v3492_v24 = vld [vmem:[%s4859_s2 + $0x300] ss:$16 sps:$4 sm:$0xff]  }
  0x50   :  { %1117 = vmatprep.subr.bf16.mxu0 %v3422_v15  ;;  %1199 = vmatprep.subr.bf16.mxu1 %v3425_v25  ;;  %v3485_v15 = vld [vmem:[%s4859_s2 + $0x2cc] ss:$16 sps:$4 sm:$0xff]   ;;  %v3495_v25 = vld [vmem:[%s4859_s2 + $0x308] ss:$16 sps:$4 sm:$0xff]  }
  0x53   :  { %1118 = vmatpush1.bf16.msra.mxu0 %v3420_v18  ;;  %1200 = vmatpush1.bf16.msra.mxu1 %v3423_v27  ;;  %v3488_v18 = vld [vmem:[%s4859_s2 + $0x2e4] ss:$16 sps:$4 sm:$0xff]   ;;  %v3503_v27 = vld [vmem:[%s4859_s2 + $0x32c] ss:$16 sps:$4 sm:$0xff]  }
  0x54   :  { %1119 = vmatprep.subr.bf16.mxu0 %v3428_v19  ;;  %1201 = vmatprep.subr.bf16.mxu1 %v3431_v28  ;;  %v3491_v19 = vld [vmem:[%s4859_s2 + $0x2ec] ss:$16 sps:$4 sm:$0xff]   ;;  %v3498_v28 = vld [vmem:[%s4859_s2 + $0x320] ss:$16 sps:$4 sm:$0xff]  }
  0x57   :  { %1120 = vmatpush1.bf16.msra.mxu0 %v3426_v22  ;;  %1202 = vmatpush1.bf16.msra.mxu1 %v3429_v29  ;;  %v3494_v22 = vld [vmem:[%s4859_s2 + $0x304] ss:$16 sps:$4 sm:$0xff]   ;;  %v3501_v29 = vld [vmem:[%s4859_s2 + $0x328] ss:$16 sps:$4 sm:$0xff]  }
  0x58   :  { %1121 = vmatprep.subr.bf16.mxu0 %v3434_v23  ;;  %1203 = vmatprep.subr.bf16.mxu1 %v3437_v30  ;;  %v3497_v23 = vld [vmem:[%s4859_s2 + $0x30c] ss:$16 sps:$4 sm:$0xff]   ;;  %v3506_v30 = vld [vmem:[%s4859_s2 + $0x344] ss:$16 sps:$4 sm:$0xff]  }
  0x5b   :  { %1122 = vmatpush1.bf16.msra.mxu0 %v3432_v26  ;;  %1204 = vmatpush1.bf16.msra.mxu1 %v3435_v31  ;;  %v3500_v26 = vld [vmem:[%s4859_s2 + $0x324] ss:$16 sps:$4 sm:$0xff]   ;;  %v3509_v31 = vld [vmem:[%s4859_s2 + $0x34c] ss:$16 sps:$4 sm:$0xff]  }
  0x5c   :  { %1123 = vmatprep.subr.bf16.mxu0 %v3440_v32  ;;  %1205 = vmatprep.subr.bf16.mxu1 %v3443_v33  ;;  %v3504_v32 = vld [vmem:[%s4859_s2 + $0x340] ss:$16 sps:$4 sm:$0xff]   ;;  %v3507_v33 = vld [vmem:[%s4859_s2 + $0x348] ss:$16 sps:$4 sm:$0xff]  }
  0x5f   :  { %1124 = vmatpush1.bf16.msra.mxu0 %v3438_v34  ;;  %1206 = vmatpush1.bf16.msra.mxu1 %v3441_v35  ;;  %v3512_v34 = vld [vmem:[%s4859_s2 + $0x364] ss:$16 sps:$4 sm:$0xff]   ;;  %v3515_v35 = vld [vmem:[%s4859_s2 + $0x36c] ss:$16 sps:$4 sm:$0xff]  }
  0x60   :  { %1134 = vmatprep.subr.bf16.mxu0 %v3446_v36  ;;  %1216 = vmatprep.subr.bf16.mxu1 %v3449_v37  ;;  %v3510_v36 = vld [vmem:[%s4859_s2 + $0x360] ss:$16 sps:$4 sm:$0xff]   ;;  %v3513_v37 = vld [vmem:[%s4859_s2 + $0x368] ss:$16 sps:$4 sm:$0xff]  }
  0xf5   :  { %v261_v38 = vpop.f32.mrb[0].mxu0  ;;  %v4146_v56 = vpop.f32.mrb[0].mxu1 }
  0xf6   :  { %vm309_vm0 = vcmp.gt.f32.partialorder %v261_v38, 0.0  ;;  %v313_v39 = vmul.f32 0.01, %v261_v38  ;;  %v263_v40 = vpop.f32.mrb[1].mxu0  ;;  %v304_v58 = vpop.f32.mrb[1].mxu1  ;;  %vm311_vm3 = vcmp.gt.f32.partialorder %v4146_v56, 0.0 }
  0xf7   :  { %vm310_vm1 = vcmp.gt.f32.partialorder %v263_v40, 0.0  ;;  %v314_v41 = vmul.f32 0.01, %v263_v40  ;;  %v265_v42 = vpop.f32.mrb[2].mxu0  ;;  %vm312_vm2 = vcmp.gt.f32.partialorder %v304_v58, 0.0  ;;  %v306_v61 = vpop.f32.mrb[2].mxu1 }
  0xf8   :  { %v317_v43 = vsel %vm309_vm0, %v261_v38, %v313_v39  ;;  %v266_v44 = vpop.f32.mrb[3].mxu0  ;;  %v316_v60 = vmul.f32 0.01, %v304_v58  ;;  %v307_v0 = vpop.f32.mrb[3].mxu1  ;;  %v3518_v38 = vld [vmem:[%s4859_s2 + $0x384] ss:$16 sps:$4 sm:$0xff]  }
  0xf9   :  { %v318_v45 = vsel %vm310_vm1, %v263_v40, %v314_v41  ;;  %v321_v49 = vpack.c.bf16 %v317_v43, %v317_v43  ;;  %v3521_v39 = vld [vmem:[%s4859_s2 + $0x38c] ss:$16 sps:$4 sm:$0xff]   ;;  %v3516_v40 = vld [vmem:[%s4859_s2 + $0x380] ss:$16 sps:$4 sm:$0xff]   ;;  %v3519_v41 = vld [vmem:[%s4859_s2 + $0x388] ss:$16 sps:$4 sm:$0xff]  }
  0xfa   :  { %v322_v46 = vpack.c.bf16 %v318_v45, %v318_v45  ;;  %v320_v2 = vsel %vm312_vm2, %v304_v58, %v316_v60  ;;  %v3524_v42 = vld [vmem:[%s4859_s2 + $0x3a4] ss:$16 sps:$4 sm:$0xff]   ;;  %v3527_v43 = vld [vmem:[%s4859_s2 + $0x3ac] ss:$16 sps:$4 sm:$0xff]   ;;  %v3522_v44 = vld [vmem:[%s4859_s2 + $0x3a0] ss:$16 sps:$4 sm:$0xff]  }
  0xfb   :  { %v324_v3 = vpack.c.bf16 %v320_v2, %v320_v2  ;;  %v3525_v45 = vld [vmem:[%s4859_s2 + $0x3a8] ss:$16 sps:$4 sm:$0xff]   ;;  %v3543_v60 = vld [vmem:[%s4861_s3 + $0x80] sm:$0xff]   ;;  %v3548_v2 = vld [vmem:[%s4861_s3 + $0x50] sm:$0xff]  }
  0xfc   :  { %1125 = vmatprep.mubr.bf16.mxu0 %v322_v46  ;;  %1207 = vmatprep.mubr.bf16.mxu1 %v322_v46  ;;  %v3530_v46 = vld [vmem:[%s4859_s2 + $0x3c4] ss:$16 sps:$4 sm:$0xff]   ;;  %v3547_v0 = vld [vmem:[%s4861_s3 + $0x88] sm:$0xff]  }
  0xfd   :  { %1126 = vmatmul.mubr.bf16.vlgmr.msra.gmra.mrb[4].mxu0 %v321_v49  ;;  %1208 = vmatmul.mubr.bf16.vlgmr.msra.gmra.mrb[4].mxu1 %v321_v49  ;;  %v3531_v49 = vld [vmem:[%s4859_s2 + $0x3c8] ss:$16 sps:$4 sm:$0xff]  }
  0xfe   :  { %1135 = vmatpush1.bf16.msra.mxu0 %v3444_v47  ;;  %1217 = vmatpush1.bf16.msra.mxu1 %v3447_v48  ;;  %v3533_v47 = vld [vmem:[%s4859_s2 + $0x3cc] ss:$16 sps:$4 sm:$0xff]   ;;  %v3528_v48 = vld [vmem:[%s4859_s2 + $0x3c0] ss:$16 sps:$4 sm:$0xff]  }
  0xff   :  { %1136 = vmatprep.subr.bf16.mxu0 %v3452_v50  ;;  %1218 = vmatprep.subr.bf16.mxu1 %v3455_v51  ;;  %v3536_v50 = vld [vmem:[%s4859_s2 + $0x3e4] ss:$16 sps:$4 sm:$0xff]   ;;  %v3539_v51 = vld [vmem:[%s4859_s2 + $0x3ec] ss:$16 sps:$4 sm:$0xff]  }
 0x100   :  { %1166 = vmatprep.mubr.bf16.mxu0 %v324_v3  ;;  %1248 = vmatprep.mubr.bf16.mxu1 %v324_v3  ;;  %v3549_v3 = vld [vmem:[%s4861_s3 + $0xd0] sm:$0xff]  }
 0x102   :  { %1137 = vmatpush1.bf16.msra.mxu0 %v3450_v52  ;;  %1219 = vmatpush1.bf16.msra.mxu1 %v3453_v53  ;;  %v315_v52 = vmul.f32 0.01, %v4146_v56  ;;  %v3534_v53 = vld [vmem:[%s4859_s2 + $0x3e0] ss:$16 sps:$4 sm:$0xff]  }
 0x103   :  { %1138 = vmatprep.subr.bf16.mxu0 %v3458_v54  ;;  %1220 = vmatprep.subr.bf16.mxu1 %v3461_v55  ;;  %v3537_v54 = vld [vmem:[%s4859_s2 + $0x3e8] ss:$16 sps:$4 sm:$0xff]   ;;  %v3540_v55 = vld [vmem:[%s4861_s3 + $0x40] sm:$0xff]  }
 0x104   :  { %v319_v58 = vsel %vm311_vm3, %v4146_v56, %v315_v52  ;;  %v3545_v56 = vld [vmem:[%s4861_s3 + $0xc8] sm:$0xff]   ;;  %v3578_v52 = vld [vmem:[%s4862_s4 + $0x20] ss:$16 sps:$4 sm:$0xff]  }
 0x105   :  { %v323_v61 = vpack.c.bf16 %v319_v58, %v319_v58  ;;  %v3587_v58 = vld [vmem:[%s4862_s4 + $0x48] ss:$16 sps:$4 sm:$0xff]  }
 0x106   :  { %1139 = vmatpush1.bf16.msra.mxu0 %v3456_v57  ;;  %1221 = vmatpush1.bf16.msra.mxu1 %v3459_v59  ;;  %v3541_v57 = vld [vmem:[%s4861_s3 + $0xc0] sm:$0xff]  }
 0x107   :  { %1140 = vmatprep.subr.bf16.mxu0 %v3464_v62  ;;  %1222 = vmatprep.subr.bf16.mxu1 %v3467_v63  ;;  %v3542_v59 = vld [vmem:[%s4861_s3] sm:$0xff]   ;;  %v3544_v62 = vld [vmem:[%s4861_s3 + $0x48] sm:$0xff]  }
 0x108   :  { %v3546_v63 = vld [vmem:[%s4861_s3 + $0x8] sm:$0xff]  }
 0x10a   :  { %1141 = vmatpush1.bf16.msra.mxu0 %v3462_v4  ;;  %1223 = vmatpush1.bf16.msra.mxu1 %v3465_v5  ;;  %v3550_v4 = vld [vmem:[%s4861_s3 + $0x10] sm:$0xff]  }
 0x10b   :  { %1142 = vmatprep.subr.bf16.mxu0 %v3470_v6  ;;  %1224 = vmatprep.subr.bf16.mxu1 %v3473_v7  ;;  %v3551_v5 = vld [vmem:[%s4861_s3 + $0x90] sm:$0xff]   ;;  %v3552_v6 = vld [vmem:[%s4861_s3 + $0x58] sm:$0xff]  }
 0x10c   :  { %v3553_v7 = vld [vmem:[%s4861_s3 + $0xd8] sm:$0xff]  }
 0x10e   :  { %1143 = vmatpush1.bf16.msra.mxu0 %v3468_v8  ;;  %1225 = vmatpush1.bf16.msra.mxu1 %v3471_v9  ;;  %v3554_v8 = vld [vmem:[%s4861_s3 + $0x18] sm:$0xff]  }
 0x10f   :  { %1144 = vmatprep.subr.bf16.mxu0 %v3476_v10  ;;  %1226 = vmatprep.subr.bf16.mxu1 %v3479_v11  ;;  %v3555_v9 = vld [vmem:[%s4861_s3 + $0x98] sm:$0xff]   ;;  %v3556_v10 = vld [vmem:[%s4861_s3 + $0x60] sm:$0xff]  }
 0x110   :  { %v3557_v11 = vld [vmem:[%s4861_s3 + $0xe0] sm:$0xff]  }
 0x112   :  { %1145 = vmatpush1.bf16.msra.mxu0 %v3474_v12  ;;  %1227 = vmatpush1.bf16.msra.mxu1 %v3477_v13  ;;  %v3558_v12 = vld [vmem:[%s4861_s3 + $0x20] sm:$0xff]  }
 0x113   :  { %1146 = vmatprep.subr.bf16.mxu0 %v3482_v14  ;;  %1228 = vmatprep.subr.bf16.mxu1 %v3485_v15  ;;  %v3559_v13 = vld [vmem:[%s4861_s3 + $0xa0] sm:$0xff]   ;;  %v3560_v14 = vld [vmem:[%s4861_s3 + $0x68] sm:$0xff]  }
 0x114   :  { %v3561_v15 = vld [vmem:[%s4861_s3 + $0xe8] sm:$0xff]  }
 0x116   :  { %1147 = vmatpush1.bf16.msra.mxu0 %v3480_v16  ;;  %1229 = vmatpush1.bf16.msra.mxu1 %v3483_v17  ;;  %v3562_v16 = vld [vmem:[%s4861_s3 + $0x28] sm:$0xff]  }
 0x117   :  { %1148 = vmatprep.subr.bf16.mxu0 %v3488_v18  ;;  %1230 = vmatprep.subr.bf16.mxu1 %v3491_v19  ;;  %v3563_v17 = vld [vmem:[%s4861_s3 + $0xa8] sm:$0xff]   ;;  %v3564_v18 = vld [vmem:[%s4861_s3 + $0x70] sm:$0xff]  }
 0x118   :  { %v3565_v19 = vld [vmem:[%s4861_s3 + $0xf0] sm:$0xff]  }
 0x11a   :  { %1149 = vmatpush1.bf16.msra.mxu0 %v3486_v20  ;;  %1231 = vmatpush1.bf16.msra.mxu1 %v3489_v21  ;;  %v3566_v20 = vld [vmem:[%s4861_s3 + $0x30] sm:$0xff]  }
 0x11b   :  { %1150 = vmatprep.subr.bf16.mxu0 %v3494_v22  ;;  %1232 = vmatprep.subr.bf16.mxu1 %v3497_v23  ;;  %v3567_v21 = vld [vmem:[%s4861_s3 + $0xb0] sm:$0xff]   ;;  %v3568_v22 = vld [vmem:[%s4861_s3 + $0x78] sm:$0xff]  }
 0x11c   :  { %v3569_v23 = vld [vmem:[%s4861_s3 + $0xf8] sm:$0xff]  }
 0x11e   :  { %1151 = vmatpush1.bf16.msra.mxu0 %v3492_v24  ;;  %1233 = vmatpush1.bf16.msra.mxu1 %v3495_v25  ;;  %v3570_v24 = vld [vmem:[%s4861_s3 + $0x38] sm:$0xff]  }
 0x11f   :  { %1152 = vmatprep.subr.bf16.mxu0 %v3500_v26  ;;  %1234 = vmatprep.subr.bf16.mxu1 %v3503_v27  ;;  %v3571_v25 = vld [vmem:[%s4861_s3 + $0xb8] sm:$0xff]   ;;  %v3574_v26 = vld [vmem:[%s4862_s4 + $0x4] ss:$16 sps:$4 sm:$0xff]  }
 0x120   :  { %v3577_v27 = vld [vmem:[%s4862_s4 + $0xc] ss:$16 sps:$4 sm:$0xff]  }
 0x122   :  { %1153 = vmatpush1.bf16.msra.mxu0 %v3498_v28  ;;  %1235 = vmatpush1.bf16.msra.mxu1 %v3501_v29 }
 0x123   :  { %1154 = vmatprep.subr.bf16.mxu0 %v3506_v30  ;;  %1236 = vmatprep.subr.bf16.mxu1 %v3509_v31 }
 0x126   :  { %1155 = vmatpush1.bf16.msra.mxu0 %v3504_v32  ;;  %1237 = vmatpush1.bf16.msra.mxu1 %v3507_v33 }
 0x127   :  { %1156 = vmatprep.subr.bf16.mxu0 %v3512_v34  ;;  %1238 = vmatprep.subr.bf16.mxu1 %v3515_v35 }
 0x12a   :  { %1157 = vmatpush1.bf16.msra.mxu0 %v3510_v36  ;;  %1239 = vmatpush1.bf16.msra.mxu1 %v3513_v37 }
 0x12b   :  { %1158 = vmatprep.subr.bf16.mxu0 %v3518_v38  ;;  %1240 = vmatprep.subr.bf16.mxu1 %v3521_v39 }
 0x12e   :  { %1159 = vmatpush1.bf16.msra.mxu0 %v3516_v40  ;;  %1241 = vmatpush1.bf16.msra.mxu1 %v3519_v41 }
 0x12f   :  { %1160 = vmatprep.subr.bf16.mxu0 %v3524_v42  ;;  %1242 = vmatprep.subr.bf16.mxu1 %v3527_v43 }
 0x132   :  { %1161 = vmatpush1.bf16.msra.mxu0 %v3522_v44  ;;  %1243 = vmatpush1.bf16.msra.mxu1 %v3525_v45  ;;  %v3572_v45 = vld [vmem:[%s4862_s4] ss:$16 sps:$4 sm:$0xff]  }
 0x133   :  { %1162 = vmatprep.subr.bf16.mxu0 %v3530_v46  ;;  %1244 = vmatprep.subr.bf16.mxu1 %v3533_v47 }
 0x136   :  { %1163 = vmatpush1.bf16.msra.mxu0 %v3528_v48  ;;  %1245 = vmatpush1.bf16.msra.mxu1 %v3531_v49  ;;  %v3575_v48 = vld [vmem:[%s4862_s4 + $0x8] ss:$16 sps:$4 sm:$0xff]   ;;  %v3580_v49 = vld [vmem:[%s4862_s4 + $0x24] ss:$16 sps:$4 sm:$0xff]  }
 0x137   :  { %1164 = vmatprep.subr.bf16.mxu0 %v3536_v50  ;;  %1246 = vmatprep.subr.bf16.mxu1 %v3539_v51  ;;  %v3583_v51 = vld [vmem:[%s4862_s4 + $0x2c] ss:$16 sps:$4 sm:$0xff]  }
 0x13a   :  { %1165 = vmatpush1.bf16.msra.mxu0 %v3534_v53  ;;  %1247 = vmatpush1.bf16.msra.mxu1 %v3537_v54  ;;  %v3581_v53 = vld [vmem:[%s4862_s4 + $0x28] ss:$16 sps:$4 sm:$0xff]   ;;  %v3586_v54 = vld [vmem:[%s4862_s4 + $0x44] ss:$16 sps:$4 sm:$0xff]  }
 0x13b   :  { %3199 = vmatprep.subr.bf16.mxu0 %v3540_v55  ;;  %3221 = vmatprep.subr.bf16.mxu1 %v3541_v57  ;;  %v3589_v55 = vld [vmem:[%s4862_s4 + $0x4c] ss:$16 sps:$4 sm:$0xff]   ;;  %v3584_v57 = vld [vmem:[%s4862_s4 + $0x40] ss:$16 sps:$4 sm:$0xff]  }
 0x13d   :  { %1167 = vmatmul.mubr.bf16.vlgmr.msra.gmra.mrb[4].mxu0 %v323_v61  ;;  %1249 = vmatmul.mubr.bf16.vlgmr.msra.gmra.mrb[4].mxu1 %v323_v61  ;;  %v3590_v61 = vld [vmem:[%s4862_s4 + $0x60] ss:$16 sps:$4 sm:$0xff]  }
 0x13e   :  { %3200 = vmatpush3.bf16.msra.mxu0 %v3542_v59  ;;  %3222 = vmatpush3.bf16.msra.mxu1 %v3543_v60  ;;  %v3592_v59 = vld [vmem:[%s4862_s4 + $0x64] ss:$16 sps:$4 sm:$0xff]   ;;  %v3595_v60 = vld [vmem:[%s4862_s4 + $0x6c] ss:$16 sps:$4 sm:$0xff]  }
 0x13f   :  { %3201 = vmatprep.subr.bf16.mxu0 %v3544_v62  ;;  %3223 = vmatprep.subr.bf16.mxu1 %v3545_v56  ;;  %v3593_v62 = vld [vmem:[%s4862_s4 + $0x68] ss:$16 sps:$4 sm:$0xff]   ;;  %v3598_v56 = vld [vmem:[%s4862_s4 + $0x84] ss:$16 sps:$4 sm:$0xff]  }
 0x142   :  { %3202 = vmatpush3.bf16.msra.mxu0 %v3546_v63  ;;  %3224 = vmatpush3.bf16.msra.mxu1 %v3547_v0  ;;  %v3601_v63 = vld [vmem:[%s4862_s4 + $0x8c] ss:$16 sps:$4 sm:$0xff]   ;;  %v3596_v0 = vld [vmem:[%s4862_s4 + $0x80] ss:$16 sps:$4 sm:$0xff]  }
 0x143   :  { %3203 = vmatprep.subr.bf16.mxu0 %v3548_v2  ;;  %3225 = vmatprep.subr.bf16.mxu1 %v3549_v3  ;;  %v3599_v2 = vld [vmem:[%s4862_s4 + $0x88] ss:$16 sps:$4 sm:$0xff]   ;;  %v3604_v3 = vld [vmem:[%s4862_s4 + $0xa4] ss:$16 sps:$4 sm:$0xff]  }
 0x146   :  { %3204 = vmatpush3.bf16.msra.mxu0 %v3550_v4  ;;  %3226 = vmatpush3.bf16.msra.mxu1 %v3551_v5  ;;  %v3607_v4 = vld [vmem:[%s4862_s4 + $0xac] ss:$16 sps:$4 sm:$0xff]   ;;  %v3602_v5 = vld [vmem:[%s4862_s4 + $0xa0] ss:$16 sps:$4 sm:$0xff]  }
 0x147   :  { %3205 = vmatprep.subr.bf16.mxu0 %v3552_v6  ;;  %3227 = vmatprep.subr.bf16.mxu1 %v3553_v7  ;;  %v3605_v6 = vld [vmem:[%s4862_s4 + $0xa8] ss:$16 sps:$4 sm:$0xff]   ;;  %v3610_v7 = vld [vmem:[%s4862_s4 + $0xc4] ss:$16 sps:$4 sm:$0xff]  }
 0x14a   :  { %3206 = vmatpush3.bf16.msra.mxu0 %v3554_v8  ;;  %3228 = vmatpush3.bf16.msra.mxu1 %v3555_v9  ;;  %v3613_v8 = vld [vmem:[%s4862_s4 + $0xcc] ss:$16 sps:$4 sm:$0xff]   ;;  %v3608_v9 = vld [vmem:[%s4862_s4 + $0xc0] ss:$16 sps:$4 sm:$0xff]  }
 0x14b   :  { %3207 = vmatprep.subr.bf16.mxu0 %v3556_v10  ;;  %3229 = vmatprep.subr.bf16.mxu1 %v3557_v11  ;;  %v3611_v10 = vld [vmem:[%s4862_s4 + $0xc8] ss:$16 sps:$4 sm:$0xff]   ;;  %v3616_v11 = vld [vmem:[%s4862_s4 + $0xe4] ss:$16 sps:$4 sm:$0xff]  }
 0x14e   :  { %3208 = vmatpush3.bf16.msra.mxu0 %v3558_v12  ;;  %3230 = vmatpush3.bf16.msra.mxu1 %v3559_v13  ;;  %v3619_v12 = vld [vmem:[%s4862_s4 + $0xec] ss:$16 sps:$4 sm:$0xff]   ;;  %v3614_v13 = vld [vmem:[%s4862_s4 + $0xe0] ss:$16 sps:$4 sm:$0xff]  }
 0x14f   :  { %3209 = vmatprep.subr.bf16.mxu0 %v3560_v14  ;;  %3231 = vmatprep.subr.bf16.mxu1 %v3561_v15  ;;  %v3617_v14 = vld [vmem:[%s4862_s4 + $0xe8] ss:$16 sps:$4 sm:$0xff]   ;;  %v3622_v15 = vld [vmem:[%s4863_s5 + $0x4] ss:$8 sps:$4 sm:$0xff]  }
 0x152   :  { %3210 = vmatpush3.bf16.msra.mxu0 %v3562_v16  ;;  %3232 = vmatpush3.bf16.msra.mxu1 %v3563_v17 }
 0x153   :  { %3211 = vmatprep.subr.bf16.mxu0 %v3564_v18  ;;  %3233 = vmatprep.subr.bf16.mxu1 %v3565_v19 }
 0x156   :  { %3212 = vmatpush3.bf16.msra.mxu0 %v3566_v20  ;;  %3234 = vmatpush3.bf16.msra.mxu1 %v3567_v21 }
 0x157   :  { %3213 = vmatprep.subr.bf16.mxu0 %v3568_v22  ;;  %3235 = vmatprep.subr.bf16.mxu1 %v3569_v23 }
 0x15a   :  { %3214 = vmatpush3.bf16.msra.mxu0 %v3570_v24  ;;  %3236 = vmatpush3.bf16.msra.mxu1 %v3571_v25 }
 0x15b   :  { %1803 = vmatprep.subr.bf16.mxu0 %v3574_v26  ;;  %1844 = vmatprep.subr.bf16.mxu1 %v3577_v27  ;;  %v3620_v27 = vld [vmem:[%s4863_s5] ss:$8 sps:$4 sm:$0xff]  }
 0x210   :  { %v1168_v28 = vpop.f32.mrb[4].mxu0  ;;  %v1250_v29 = vpop.f32.mrb[4].mxu1 }
 0x211   :  { %vm1257_vm4 = vcmp.gt.f32.partialorder %v1168_v28, 0.0  ;;  %v1261_v30 = vmul.f32 0.01, %v1168_v28  ;;  %v1263_v31 = vmul.f32 0.01, %v1250_v29  ;;  %vm1259_vm5 = vcmp.gt.f32.partialorder %v1250_v29, 0.0 }
 0x212   :  { %v1170_v32 = vpop.f32.mrb[5].mxu0  ;;  %v1252_v33 = vpop.f32.mrb[5].mxu1 }
 0x213   :  { %vm1258_vm6 = vcmp.gt.f32.partialorder %v1170_v32, 0.0  ;;  %v1262_v34 = vmul.f32 0.01, %v1170_v32  ;;  %v1172_v35 = vpop.f32.mrb[6].mxu0  ;;  %v1254_v36 = vpop.f32.mrb[6].mxu1  ;;  %v1265_v37 = vsel %vm1257_vm4, %v1168_v28, %v1261_v30  ;;  %vm1260_vm7 = vcmp.gt.f32.partialorder %v1252_v33, 0.0 }
 0x214   :  { %v1264_v38 = vmul.f32 0.01, %v1252_v33  ;;  %v1173_v39 = vpop.f32.mrb[7].mxu0  ;;  %v1255_v40 = vpop.f32.mrb[7].mxu1  ;;  %v1267_v41 = vsel %vm1259_vm5, %v1250_v29, %v1263_v31  ;;  %v1269_v46 = vpack.c.bf16 %v1265_v37, %v1265_v37  ;;  %v3625_v29 = vld [vmem:[%s4863_s5 + $0x14] ss:$8 sps:$4 sm:$0xff]  }
 0x215   :  { %v1266_v42 = vsel %vm1258_vm6, %v1170_v32, %v1262_v34  ;;  %v1271_v50 = vpack.c.bf16 %v1267_v41, %v1267_v41  ;;  %v3623_v30 = vld [vmem:[%s4863_s5 + $0x10] ss:$8 sps:$4 sm:$0xff]   ;;  %v3628_v31 = vld [vmem:[%s4863_s5 + $0x24] ss:$8 sps:$4 sm:$0xff]   ;;  %v3626_v32 = vld [vmem:[%s4863_s5 + $0x20] ss:$8 sps:$4 sm:$0xff]  }
 0x216   :  { %v1270_v43 = vpack.c.bf16 %v1266_v42, %v1266_v42  ;;  %v1268_v44 = vsel %vm1260_vm7, %v1252_v33, %v1264_v38  ;;  %v3631_v33 = vld [vmem:[%s4863_s5 + $0x34] ss:$8 sps:$4 sm:$0xff]   ;;  %v3629_v34 = vld [vmem:[%s4863_s5 + $0x30] ss:$8 sps:$4 sm:$0xff]   ;;  %v3634_v35 = vld [vmem:[%s4863_s5 + $0x44] ss:$8 sps:$4 sm:$0xff]  }
 0x217   :  { %v1272_v47 = vpack.c.bf16 %v1268_v44, %v1268_v44  ;;  %v3632_v36 = vld [vmem:[%s4863_s5 + $0x40] ss:$8 sps:$4 sm:$0xff]   ;;  %v3637_v37 = vld [vmem:[%s4863_s5 + $0x54] ss:$8 sps:$4 sm:$0xff]   ;;  %v3635_v38 = vld [vmem:[%s4863_s5 + $0x50] ss:$8 sps:$4 sm:$0xff]  }
 0x218   :  { %1561 = vmatprep.mubr.bf16.mxu0 %v1270_v43  ;;  %v3640_v39 = vld [vmem:[%s4863_s5 + $0x64] ss:$8 sps:$4 sm:$0xff]   ;;  %v3638_v40 = vld [vmem:[%s4863_s5 + $0x60] ss:$8 sps:$4 sm:$0xff]   ;;  %v3643_v41 = vld [vmem:[%s4863_s5 + $0x74] ss:$8 sps:$4 sm:$0xff]  }
 0x219   :  { %1601 = vmatprep.mubr.bf16.mxu1 %v1272_v47  ;;  %1562 = vmatmul.mubr.bf16.vlgmr.msra.gmra.mrb[8].mxu0 %v1269_v46  ;;  %v3641_v42 = vld [vmem:[%s4863_s5 + $0x70] ss:$8 sps:$4 sm:$0xff]   ;;  %v3646_v43 = vld [vmem:[%s4863_s5 + $0x84] ss:$8 sps:$4 sm:$0xff]   ;;  %v3644_v44 = vld [vmem:[%s4863_s5 + $0x80] ss:$8 sps:$4 sm:$0xff]  }
 0x21a   :  { %1602 = vmatmul.mubr.bf16.vlgmr.msra.gmra.mrb[8].mxu1 %v1271_v50  ;;  %1804 = vmatpush1.bf16.msra.mxu0 %v3572_v45  ;;  %v3649_v45 = vld [vmem:[%s4863_s5 + $0x94] ss:$8 sps:$4 sm:$0xff]   ;;  %v3647_v46 = vld [vmem:[%s4863_s5 + $0x90] ss:$8 sps:$4 sm:$0xff]   ;;  %v3652_v47 = vld [vmem:[%s4863_s5 + $0xa4] ss:$8 sps:$4 sm:$0xff]  }
 0x21b   :  { %1845 = vmatpush1.bf16.msra.mxu1 %v3575_v48  ;;  %1805 = vmatprep.subr.bf16.mxu0 %v3580_v49  ;;  %v3650_v48 = vld [vmem:[%s4863_s5 + $0xa0] ss:$8 sps:$4 sm:$0xff]   ;;  %v3655_v49 = vld [vmem:[%s4863_s5 + $0xb4] ss:$8 sps:$4 sm:$0xff]   ;;  %v3653_v50 = vld [vmem:[%s4863_s5 + $0xb0] ss:$8 sps:$4 sm:$0xff]  }
 0x21c   :  { %1846 = vmatprep.subr.bf16.mxu1 %v3583_v51  ;;  %1835 = vmatprep.mubr.bf16.mxu0 %v3772_v1  ;;  %v3658_v51 = vld [vmem:[%s4863_s5 + $0xc4] ss:$8 sps:$4 sm:$0xff]  }
 0x21d   :  { %1876 = vmatprep.mubr.bf16.mxu1 %v3772_v1 }
 0x21e   :  { %1806 = vmatpush1.bf16.msra.mxu0 %v3578_v52  ;;  %v3656_v52 = vld [vmem:[%s4863_s5 + $0xc0] ss:$8 sps:$4 sm:$0xff]  }
 0x21f   :  { %1847 = vmatpush1.bf16.msra.mxu1 %v3581_v53  ;;  %1807 = vmatprep.subr.bf16.mxu0 %v3586_v54  ;;  %v3661_v53 = vld [vmem:[%s4863_s5 + $0xd4] ss:$8 sps:$4 sm:$0xff]   ;;  %v3659_v54 = vld [vmem:[%s4863_s5 + $0xd0] ss:$8 sps:$4 sm:$0xff]  }
 0x220   :  { %1848 = vmatprep.subr.bf16.mxu1 %v3589_v55  ;;  %v3664_v55 = vld [vmem:[%s4863_s5 + $0xe4] ss:$8 sps:$4 sm:$0xff]  }
 0x222   :  { %1808 = vmatpush1.bf16.msra.mxu0 %v3584_v57  ;;  %v3662_v57 = vld [vmem:[%s4863_s5 + $0xe0] ss:$8 sps:$4 sm:$0xff]  }
 0x223   :  { %1849 = vmatpush1.bf16.msra.mxu1 %v3587_v58  ;;  %1809 = vmatprep.subr.bf16.mxu0 %v3592_v59  ;;  %v3667_v58 = vld [vmem:[%s4863_s5 + $0xf4] ss:$8 sps:$4 sm:$0xff]   ;;  %v3665_v59 = vld [vmem:[%s4863_s5 + $0xf0] ss:$8 sps:$4 sm:$0xff]  }
 0x224   :  { %1850 = vmatprep.subr.bf16.mxu1 %v3595_v60  ;;  %v3670_v60 = vld [vmem:[%s4863_s5 + $0x104] ss:$8 sps:$4 sm:$0xff]  }
 0x226   :  { %1810 = vmatpush1.bf16.msra.mxu0 %v3590_v61  ;;  %v3716_v61 = vld [vmem:[%s4865_s6 + $0x40] sm:$0xff]  }
 0x227   :  { %1851 = vmatpush1.bf16.msra.mxu1 %v3593_v62  ;;  %1811 = vmatprep.subr.bf16.mxu0 %v3598_v56  ;;  %v3717_v62 = vld [vmem:[%s4865_s6] sm:$0xff]   ;;  %v3718_v56 = vld [vmem:[%s4865_s6 + $0x48] sm:$0xff]  }
 0x228   :  { %1852 = vmatprep.subr.bf16.mxu1 %v3601_v63  ;;  %v3719_v63 = vld [vmem:[%s4865_s6 + $0x8] sm:$0xff]  }
 0x22a   :  { %1812 = vmatpush1.bf16.msra.mxu0 %v3596_v0  ;;  %v3720_v0 = vld [vmem:[%s4865_s6 + $0x50] sm:$0xff]  }
 0x22b   :  { %1853 = vmatpush1.bf16.msra.mxu1 %v3599_v2  ;;  %1813 = vmatprep.subr.bf16.mxu0 %v3604_v3  ;;  %v3721_v2 = vld [vmem:[%s4865_s6 + $0x10] sm:$0xff]   ;;  %v3722_v3 = vld [vmem:[%s4865_s6 + $0x58] sm:$0xff]  }
 0x22c   :  { %1854 = vmatprep.subr.bf16.mxu1 %v3607_v4  ;;  %v3723_v4 = vld [vmem:[%s4865_s6 + $0x18] sm:$0xff]  }
 0x22e   :  { %1814 = vmatpush1.bf16.msra.mxu0 %v3602_v5  ;;  %v3724_v5 = vld [vmem:[%s4865_s6 + $0x60] sm:$0xff]  }
 0x22f   :  { %1855 = vmatpush1.bf16.msra.mxu1 %v3605_v6  ;;  %1815 = vmatprep.subr.bf16.mxu0 %v3610_v7  ;;  %v3725_v6 = vld [vmem:[%s4865_s6 + $0x20] sm:$0xff]   ;;  %v3726_v7 = vld [vmem:[%s4865_s6 + $0x68] sm:$0xff]  }
 0x230   :  { %1856 = vmatprep.subr.bf16.mxu1 %v3613_v8  ;;  %v3727_v8 = vld [vmem:[%s4865_s6 + $0x28] sm:$0xff]  }
 0x232   :  { %1816 = vmatpush1.bf16.msra.mxu0 %v3608_v9 }
 0x233   :  { %1857 = vmatpush1.bf16.msra.mxu1 %v3611_v10  ;;  %1817 = vmatprep.subr.bf16.mxu0 %v3616_v11 }
 0x234   :  { %1858 = vmatprep.subr.bf16.mxu1 %v3619_v12 }
 0x236   :  { %1818 = vmatpush1.bf16.msra.mxu0 %v3614_v13 }
 0x237   :  { %1859 = vmatpush1.bf16.msra.mxu1 %v3617_v14  ;;  %2285 = vmatprep.subr.bf16.mxu0 %v3622_v15 }
 0x238   :  { %3243 = vmatprep.subr.bf16.mxu1 %v3716_v61  ;;  %v3728_v61 = vld [vmem:[%s4865_s6 + $0x70] sm:$0xff]  }
 0x2ec   :  { %v3215_v16 = vpop.f32.mrb[8].mxu0 }
 0x2ed   :  { %v3237_v17 = vpop.f32.mrb[8].mxu1  ;;  %v3216_v18 = vpop.f32.mrb[9].mxu0 }
 0x2ee   :  { %v3217_v19 = vadd.f32 %v3216_v18, %v3215_v16  ;;  %v3238_v20 = vpop.f32.mrb[9].mxu1  ;;  %v3218_v21 = vpop.f32.mrb[10].mxu0 }
 0x2ef   :  { %v3239_v22 = vadd.f32 %v3238_v20, %v3237_v17  ;;  %v3240_v23 = vpop.f32.mrb[10].mxu1  ;;  %v3219_v24 = vpop.f32.mrb[11].mxu0 }
 0x2f0   :  { %v3241_v25 = vpop.f32.mrb[11].mxu1  ;;  %v3668_v24 = vld [vmem:[%s4863_s5 + $0x100] ss:$8 sps:$4 sm:$0xff]  }
 0x2f1   :  { %v1604_v26 = vadd.f32 %v3239_v22, %v3217_v19 }
 0x2f3   :  { %1609 = vst [vmem:[%s4864_s9] sm:$0xff] %v1604_v26  ;;  %v1610_v28 = vpack.c.bf16 %v1604_v26, %v1604_v26  ;;  %v3673_v26 = vld [vmem:[%s4863_s5 + $0x114] ss:$8 sps:$4 sm:$0xff]  }
 0x2f5   :  { %1836 = vmatmul.mubr.bf16.vlgmr.msra.gmra.mrb[12].mxu0 %v1610_v28  ;;  %1877 = vmatmul.mubr.bf16.vlgmr.msra.gmra.mrb[12].mxu1 %v1610_v28  ;;  %v3671_v28 = vld [vmem:[%s4863_s5 + $0x110] ss:$8 sps:$4 sm:$0xff]  }
 0x2f6   :  { %2286 = vmatpush1.bf16.msra.mxu0 %v3620_v27  ;;  %3244 = vmatpush3.bf16.msra.mxu1 %v3717_v62  ;;  %v3729_v62 = vld [vmem:[%s4865_s6 + $0x30] sm:$0xff]  }
 0x2f7   :  { %2287 = vmatprep.subr.bf16.mxu0 %v3625_v29  ;;  %3245 = vmatprep.subr.bf16.mxu1 %v3718_v56  ;;  %v3676_v29 = vld [vmem:[%s4863_s5 + $0x124] ss:$8 sps:$4 sm:$0xff]   ;;  %v3730_v56 = vld [vmem:[%s4865_s6 + $0x78] sm:$0xff]  }
 0x2fa   :  { %2288 = vmatpush1.bf16.msra.mxu0 %v3623_v30  ;;  %3246 = vmatpush3.bf16.msra.mxu1 %v3719_v63  ;;  %v3674_v30 = vld [vmem:[%s4863_s5 + $0x120] ss:$8 sps:$4 sm:$0xff]   ;;  %v3731_v63 = vld [vmem:[%s4865_s6 + $0x38] sm:$0xff]  }
 0x2fb   :  { %2289 = vmatprep.subr.bf16.mxu0 %v3628_v31  ;;  %3247 = vmatprep.subr.bf16.mxu1 %v3720_v0  ;;  %v3679_v31 = vld [vmem:[%s4863_s5 + $0x134] ss:$8 sps:$4 sm:$0xff]   ;;  %v3734_v0 = vld [vmem:[%s4866_s7 + $0x4] ss:$8 sps:$4 sm:$0xff]  }
 0x2fe   :  { %2290 = vmatpush1.bf16.msra.mxu0 %v3626_v32  ;;  %3248 = vmatpush3.bf16.msra.mxu1 %v3721_v2  ;;  %v3677_v32 = vld [vmem:[%s4863_s5 + $0x130] ss:$8 sps:$4 sm:$0xff]  }
 0x2ff   :  { %2291 = vmatprep.subr.bf16.mxu0 %v3631_v33  ;;  %3249 = vmatprep.subr.bf16.mxu1 %v3722_v3  ;;  %v3682_v33 = vld [vmem:[%s4863_s5 + $0x144] ss:$8 sps:$4 sm:$0xff]  }
 0x302   :  { %2292 = vmatpush1.bf16.msra.mxu0 %v3629_v34  ;;  %3250 = vmatpush3.bf16.msra.mxu1 %v3723_v4  ;;  %v3680_v34 = vld [vmem:[%s4863_s5 + $0x140] ss:$8 sps:$4 sm:$0xff]  }
 0x303   :  { %2293 = vmatprep.subr.bf16.mxu0 %v3634_v35  ;;  %3251 = vmatprep.subr.bf16.mxu1 %v3724_v5  ;;  %v3685_v35 = vld [vmem:[%s4863_s5 + $0x154] ss:$8 sps:$4 sm:$0xff]  }
 0x306   :  { %2294 = vmatpush1.bf16.msra.mxu0 %v3632_v36  ;;  %3252 = vmatpush3.bf16.msra.mxu1 %v3725_v6  ;;  %v3683_v36 = vld [vmem:[%s4863_s5 + $0x150] ss:$8 sps:$4 sm:$0xff]  }
 0x307   :  { %2295 = vmatprep.subr.bf16.mxu0 %v3637_v37  ;;  %3253 = vmatprep.subr.bf16.mxu1 %v3726_v7  ;;  %v3688_v37 = vld [vmem:[%s4863_s5 + $0x164] ss:$8 sps:$4 sm:$0xff]  }
 0x30a   :  { %2296 = vmatpush1.bf16.msra.mxu0 %v3635_v38  ;;  %3254 = vmatpush3.bf16.msra.mxu1 %v3727_v8  ;;  %v3686_v38 = vld [vmem:[%s4863_s5 + $0x160] ss:$8 sps:$4 sm:$0xff]  }
 0x30b   :  { %2297 = vmatprep.subr.bf16.mxu0 %v3640_v39  ;;  %v3691_v39 = vld [vmem:[%s4863_s5 + $0x174] ss:$8 sps:$4 sm:$0xff]   ;;  %3255 = vmatprep.subr.bf16.mxu1 %v3728_v61 }
 0x30e   :  { %2298 = vmatpush1.bf16.msra.mxu0 %v3638_v40  ;;  %v3689_v40 = vld [vmem:[%s4863_s5 + $0x170] ss:$8 sps:$4 sm:$0xff]   ;;  %3256 = vmatpush3.bf16.msra.mxu1 %v3729_v62 }
 0x30f   :  { %2299 = vmatprep.subr.bf16.mxu0 %v3643_v41  ;;  %v3694_v41 = vld [vmem:[%s4863_s5 + $0x184] ss:$8 sps:$4 sm:$0xff]   ;;  %3257 = vmatprep.subr.bf16.mxu1 %v3730_v56 }
 0x312   :  { %2300 = vmatpush1.bf16.msra.mxu0 %v3641_v42  ;;  %v3692_v42 = vld [vmem:[%s4863_s5 + $0x180] ss:$8 sps:$4 sm:$0xff]   ;;  %3258 = vmatpush3.bf16.msra.mxu1 %v3731_v63 }
 0x313   :  { %2301 = vmatprep.subr.bf16.mxu0 %v3646_v43  ;;  %v3697_v43 = vld [vmem:[%s4863_s5 + $0x194] ss:$8 sps:$4 sm:$0xff]   ;;  %2641 = vmatprep.subr.bf16.mxu1 %v3734_v0 }
 0x316   :  { %2302 = vmatpush1.bf16.msra.mxu0 %v3644_v44  ;;  %v3695_v44 = vld [vmem:[%s4863_s5 + $0x190] ss:$8 sps:$4 sm:$0xff]  }
 0x317   :  { %2303 = vmatprep.subr.bf16.mxu0 %v3649_v45  ;;  %v3700_v45 = vld [vmem:[%s4863_s5 + $0x1a4] ss:$8 sps:$4 sm:$0xff]  }
 0x31a   :  { %2304 = vmatpush1.bf16.msra.mxu0 %v3647_v46  ;;  %v3698_v46 = vld [vmem:[%s4863_s5 + $0x1a0] ss:$8 sps:$4 sm:$0xff]  }
 0x31b   :  { %2305 = vmatprep.subr.bf16.mxu0 %v3652_v47  ;;  %v3703_v47 = vld [vmem:[%s4863_s5 + $0x1b4] ss:$8 sps:$4 sm:$0xff]  }
 0x31e   :  { %2306 = vmatpush1.bf16.msra.mxu0 %v3650_v48  ;;  %v3701_v48 = vld [vmem:[%s4863_s5 + $0x1b0] ss:$8 sps:$4 sm:$0xff]  }
 0x31f   :  { %2307 = vmatprep.subr.bf16.mxu0 %v3655_v49  ;;  %v3706_v49 = vld [vmem:[%s4863_s5 + $0x1c4] ss:$8 sps:$4 sm:$0xff]  }
 0x322   :  { %2308 = vmatpush1.bf16.msra.mxu0 %v3653_v50  ;;  %v3704_v50 = vld [vmem:[%s4863_s5 + $0x1c0] ss:$8 sps:$4 sm:$0xff]  }
 0x323   :  { %2309 = vmatprep.subr.bf16.mxu0 %v3658_v51  ;;  %v3709_v51 = vld [vmem:[%s4863_s5 + $0x1d4] ss:$8 sps:$4 sm:$0xff]  }
 0x326   :  { %2310 = vmatpush1.bf16.msra.mxu0 %v3656_v52  ;;  %v3707_v52 = vld [vmem:[%s4863_s5 + $0x1d0] ss:$8 sps:$4 sm:$0xff]  }
 0x327   :  { %2311 = vmatprep.subr.bf16.mxu0 %v3661_v53  ;;  %v3712_v53 = vld [vmem:[%s4863_s5 + $0x1e4] ss:$8 sps:$4 sm:$0xff]  }
 0x32a   :  { %2312 = vmatpush1.bf16.msra.mxu0 %v3659_v54  ;;  %v3710_v54 = vld [vmem:[%s4863_s5 + $0x1e0] ss:$8 sps:$4 sm:$0xff]  }
 0x32b   :  { %2313 = vmatprep.subr.bf16.mxu0 %v3664_v55  ;;  %v3715_v55 = vld [vmem:[%s4863_s5 + $0x1f4] ss:$8 sps:$4 sm:$0xff]  }
 0x32e   :  { %2314 = vmatpush1.bf16.msra.mxu0 %v3662_v57 }
 0x32f   :  { %2315 = vmatprep.subr.bf16.mxu0 %v3667_v58  ;;  %v3713_v58 = vld [vmem:[%s4863_s5 + $0x1f0] ss:$8 sps:$4 sm:$0xff]  }
 0x332   :  { %2316 = vmatpush1.bf16.msra.mxu0 %v3665_v59 }
 0x333   :  { %2326 = vmatprep.subr.bf16.mxu0 %v3670_v60 }
 0x3c8   :  { %v1837_v9 = vpop.f32.mrb[12].mxu0  ;;  %v4645_v10 = vpop.f32.mrb[12].mxu1 }
 0x3c9   :  { %vm1885_vm8 = vcmp.gt.f32.partialorder %v1837_v9, 0.0  ;;  %v1889_v11 = vmul.f32 0.01, %v1837_v9  ;;  %v1839_v12 = vpop.f32.mrb[13].mxu0  ;;  %v1880_v13 = vpop.f32.mrb[13].mxu1  ;;  %vm1887_vm11 = vcmp.gt.f32.partialorder %v4645_v10, 0.0 }
 0x3ca   :  { %vm1886_vm9 = vcmp.gt.f32.partialorder %v1839_v12, 0.0  ;;  %v1890_v14 = vmul.f32 0.01, %v1839_v12  ;;  %v1841_v15 = vpop.f32.mrb[14].mxu0  ;;  %v1882_v16 = vpop.f32.mrb[14].mxu1  ;;  %vm1888_vm10 = vcmp.gt.f32.partialorder %v1880_v13, 0.0 }
 0x3cb   :  { %v1893_v17 = vsel %vm1885_vm8, %v1837_v9, %v1889_v11  ;;  %v1892_v18 = vmul.f32 0.01, %v1880_v13  ;;  %v1842_v19 = vpop.f32.mrb[15].mxu0  ;;  %v1883_v20 = vpop.f32.mrb[15].mxu1  ;;  %v1891_v57 = vmul.f32 0.01, %v4645_v10 }
 0x3cc   :  { %v1894_v21 = vsel %vm1886_vm9, %v1839_v12, %v1890_v14  ;;  %v1897_v25 = vpack.c.bf16 %v1893_v17, %v1893_v17  ;;  %v3732_v11 = vld [vmem:[%s4866_s7] ss:$8 sps:$4 sm:$0xff]   ;;  %v3735_v14 = vld [vmem:[%s4866_s7 + $0x10] ss:$8 sps:$4 sm:$0xff]   ;;  %v3740_v15 = vld [vmem:[%s4866_s7 + $0x24] ss:$8 sps:$4 sm:$0xff]  }
 0x3cd   :  { %v1898_v22 = vpack.c.bf16 %v1894_v21, %v1894_v21  ;;  %v1896_v23 = vsel %vm1888_vm10, %v1880_v13, %v1892_v18  ;;  %v1895_v59 = vsel %vm1887_vm11, %v4645_v10, %v1891_v57  ;;  %v3737_v13 = vld [vmem:[%s4866_s7 + $0x14] ss:$8 sps:$4 sm:$0xff]   ;;  %v3738_v16 = vld [vmem:[%s4866_s7 + $0x20] ss:$8 sps:$4 sm:$0xff]   ;;  %v3746_v18 = vld [vmem:[%s4866_s7 + $0x44] ss:$8 sps:$4 sm:$0xff]  }
 0x3ce   :  { %v1900_v27 = vpack.c.bf16 %v1896_v23, %v1896_v23  ;;  %v1899_v60 = vpack.c.bf16 %v1895_v59, %v1895_v59  ;;  %v3743_v17 = vld [vmem:[%s4866_s7 + $0x34] ss:$8 sps:$4 sm:$0xff]   ;;  %v3744_v19 = vld [vmem:[%s4866_s7 + $0x40] ss:$8 sps:$4 sm:$0xff]   ;;  %v3747_v21 = vld [vmem:[%s4866_s7 + $0x50] ss:$8 sps:$4 sm:$0xff]  }
 0x3cf   :  { %2317 = vmatprep.mubr.bf16.mxu0 %v1898_v22  ;;  %v3749_v20 = vld [vmem:[%s4866_s7 + $0x54] ss:$8 sps:$4 sm:$0xff]   ;;  %v3752_v22 = vld [vmem:[%s4866_s7 + $0x64] ss:$8 sps:$4 sm:$0xff]   ;;  %v3750_v23 = vld [vmem:[%s4866_s7 + $0x60] ss:$8 sps:$4 sm:$0xff]  }
 0x3d0   :  { %2318 = vmatmul.mubr.bf16.vlgmr.msra.gmra.mrb[16].mxu0 %v1897_v25  ;;  %v3753_v25 = vld [vmem:[%s4866_s7 + $0x70] ss:$8 sps:$4 sm:$0xff]  }
 0x3d1   :  { %2327 = vmatpush1.bf16.msra.mxu0 %v3668_v24  ;;  %2358 = vmatprep.mubr.bf16.mxu0 %v1900_v27  ;;  %v3755_v24 = vld [vmem:[%s4866_s7 + $0x74] ss:$8 sps:$4 sm:$0xff]  }
 0x3d2   :  { %2328 = vmatprep.subr.bf16.mxu0 %v3673_v26  ;;  %v3756_v26 = vld [vmem:[%s4867_s8 + $0x40] sm:$0xff]  }
 0x3d5   :  { %2329 = vmatpush1.bf16.msra.mxu0 %v3671_v28 }
 0x3d6   :  { %2330 = vmatprep.subr.bf16.mxu0 %v3676_v29 }
 0x3d9   :  { %2331 = vmatpush1.bf16.msra.mxu0 %v3674_v30 }
 0x3da   :  { %2332 = vmatprep.subr.bf16.mxu0 %v3679_v31 }
 0x3dd   :  { %2333 = vmatpush1.bf16.msra.mxu0 %v3677_v32  ;;  %v3757_v32 = vld [vmem:[%s4867_s8] sm:$0xff]  }
 0x3de   :  { %2334 = vmatprep.subr.bf16.mxu0 %v3682_v33 }
 0x3e1   :  { %2335 = vmatpush1.bf16.msra.mxu0 %v3680_v34  ;;  %v3758_v34 = vld [vmem:[%s4867_s8 + $0x48] sm:$0xff]  }
 0x3e2   :  { %2336 = vmatprep.subr.bf16.mxu0 %v3685_v35  ;;  %v3759_v35 = vld [vmem:[%s4867_s8 + $0x8] sm:$0xff]  }
 0x3e5   :  { %2337 = vmatpush1.bf16.msra.mxu0 %v3683_v36  ;;  %v3760_v36 = vld [vmem:[%s4867_s8 + $0x50] sm:$0xff]  }
 0x3e6   :  { %2338 = vmatprep.subr.bf16.mxu0 %v3688_v37  ;;  %v3761_v37 = vld [vmem:[%s4867_s8 + $0x10] sm:$0xff]  }
 0x3e9   :  { %2339 = vmatpush1.bf16.msra.mxu0 %v3686_v38  ;;  %v3762_v38 = vld [vmem:[%s4867_s8 + $0x58] sm:$0xff]  }
 0x3ea   :  { %2340 = vmatprep.subr.bf16.mxu0 %v3691_v39  ;;  %v3763_v39 = vld [vmem:[%s4867_s8 + $0x18] sm:$0xff]  }
 0x3ed   :  { %2341 = vmatpush1.bf16.msra.mxu0 %v3689_v40  ;;  %v3764_v40 = vld [vmem:[%s4867_s8 + $0x60] sm:$0xff]  }
 0x3ee   :  { %2342 = vmatprep.subr.bf16.mxu0 %v3694_v41  ;;  %v3765_v41 = vld [vmem:[%s4867_s8 + $0x20] sm:$0xff]  }
 0x3f1   :  { %2343 = vmatpush1.bf16.msra.mxu0 %v3692_v42  ;;  %v3766_v42 = vld [vmem:[%s4867_s8 + $0x68] sm:$0xff]  }
 0x3f2   :  { %2344 = vmatprep.subr.bf16.mxu0 %v3697_v43  ;;  %v3767_v43 = vld [vmem:[%s4867_s8 + $0x28] sm:$0xff]  }
 0x3f5   :  { %2345 = vmatpush1.bf16.msra.mxu0 %v3695_v44  ;;  %v3768_v44 = vld [vmem:[%s4867_s8 + $0x70] sm:$0xff]  }
 0x3f6   :  { %2346 = vmatprep.subr.bf16.mxu0 %v3700_v45  ;;  %v3769_v45 = vld [vmem:[%s4867_s8 + $0x30] sm:$0xff]  }
 0x3f9   :  { %2347 = vmatpush1.bf16.msra.mxu0 %v3698_v46  ;;  %v3770_v46 = vld [vmem:[%s4867_s8 + $0x78] sm:$0xff]  }
 0x3fa   :  { %2348 = vmatprep.subr.bf16.mxu0 %v3703_v47  ;;  %v3771_v47 = vld [vmem:[%s4867_s8 + $0x38] sm:$0xff]  }
 0x3fd   :  { %2349 = vmatpush1.bf16.msra.mxu0 %v3701_v48 }
 0x3fe   :  { %2350 = vmatprep.subr.bf16.mxu0 %v3706_v49 }
 0x401   :  { %2351 = vmatpush1.bf16.msra.mxu0 %v3704_v50 }
 0x402   :  { %2352 = vmatprep.subr.bf16.mxu0 %v3709_v51 }
 0x405   :  { %2353 = vmatpush1.bf16.msra.mxu0 %v3707_v52 }
 0x406   :  { %2354 = vmatprep.subr.bf16.mxu0 %v3712_v53 }
 0x409   :  { %2355 = vmatpush1.bf16.msra.mxu0 %v3710_v54 }
 0x40a   :  { %2356 = vmatprep.subr.bf16.mxu0 %v3715_v55 }
 0x40d   :  { %2357 = vmatpush1.bf16.msra.mxu0 %v3713_v58 }
 0x410   :  { %2359 = vmatmul.mubr.bf16.vlgmr.msra.gmra.mrb[16].mxu0 %v1899_v60 }
 0x4e3   :  { %v2360_v2 = vpop.f32.mrb[16].mxu0 }
 0x4e4   :  { %vm2367_vm12 = vcmp.gt.f32.partialorder %v2360_v2, 0.0  ;;  %v2369_v3 = vmul.f32 0.01, %v2360_v2  ;;  %v2362_v4 = vpop.f32.mrb[17].mxu0 }
 0x4e5   :  { %vm2368_vm13 = vcmp.gt.f32.partialorder %v2362_v4, 0.0  ;;  %v2370_v5 = vmul.f32 0.01, %v2362_v4  ;;  %v2364_v6 = vpop.f32.mrb[18].mxu0 }
 0x4e6   :  { %v2371_v7 = vsel %vm2367_vm12, %v2360_v2, %v2369_v3  ;;  %v2365_v8 = vpop.f32.mrb[19].mxu0 }
 0x4e7   :  { %v2372_v9 = vsel %vm2368_vm13, %v2362_v4, %v2370_v5  ;;  %v2373_v12 = vpack.c.bf16 %v2371_v7, %v2371_v7 }
 0x4e8   :  { %v2374_v10 = vpack.c.bf16 %v2372_v9, %v2372_v9 }
 0x4ea   :  { %2535 = vmatprep.mubr.bf16.mxu1 %v2374_v10 }
 0x4eb   :  { %2536 = vmatmul.mubr.bf16.vlgmr.msra.gmra.mrb[16].mxu1 %v2373_v12 }
 0x4ec   :  { %2642 = vmatpush1.bf16.msra.mxu1 %v3732_v11  ;;  %2673 = vmatprep.mubr.bf16.mxu1 %v3772_v1  ;;  %v3741_v1 = vld [vmem:[%s4866_s7 + $0x30] ss:$8 sps:$4 sm:$0xff]  }
 0x4ed   :  { %2643 = vmatprep.subr.bf16.mxu1 %v3737_v13 }
 0x4f0   :  { %2644 = vmatpush1.bf16.msra.mxu1 %v3735_v14 }
 0x4f1   :  { %2645 = vmatprep.subr.bf16.mxu1 %v3740_v15 }
 0x4f4   :  { %2646 = vmatpush1.bf16.msra.mxu1 %v3738_v16 }
 0x4f5   :  { %2647 = vmatprep.subr.bf16.mxu1 %v3743_v17 }
 0x4f8   :  { %2648 = vmatpush1.bf16.msra.mxu1 %v3741_v1 }
 0x4f9   :  { %2649 = vmatprep.subr.bf16.mxu1 %v3746_v18 }
 0x4fc   :  { %2650 = vmatpush1.bf16.msra.mxu1 %v3744_v19 }
 0x4fd   :  { %2651 = vmatprep.subr.bf16.mxu1 %v3749_v20 }
 0x500   :  { %2652 = vmatpush1.bf16.msra.mxu1 %v3747_v21 }
 0x501   :  { %2653 = vmatprep.subr.bf16.mxu1 %v3752_v22 }
 0x504   :  { %2654 = vmatpush1.bf16.msra.mxu1 %v3750_v23 }
 0x505   :  { %2655 = vmatprep.subr.bf16.mxu1 %v3755_v24 }
 0x508   :  { %2656 = vmatpush1.bf16.msra.mxu1 %v3753_v25 }
 0x509   :  { %3265 = vmatprep.subr.bf16.mxu1 %v3756_v26 }
 0x5be   :  { %v3259_v27 = vpop.f32.mrb[16].mxu1 }
 0x5bf   :  { %v3260_v28 = vpop.f32.mrb[17].mxu1 }
 0x5c0   :  { %v3261_v29 = vadd.f32 %v3260_v28, %v3259_v27  ;;  %v3262_v30 = vpop.f32.mrb[18].mxu1 }
 0x5c1   :  { %v3263_v31 = vpop.f32.mrb[19].mxu1 }
 0x5c2   :  { %2543 = vst [vmem:[%s4864_s9 + $0x8] sm:$0xff] %v3261_v29  ;;  %v2544_v33 = vpack.c.bf16 %v3261_v29, %v3261_v29 }
 0x5c4   :  { %2674 = vmatmul.mubr.bf16.vlgmr.msra.gmra.mrb[20].mxu1 %v2544_v33 }
 0x5c5   :  { %3266 = vmatpush3.bf16.msra.mxu1 %v3757_v32 }
 0x5c6   :  { %3267 = vmatprep.subr.bf16.mxu1 %v3758_v34 }
 0x5c9   :  { %3268 = vmatpush3.bf16.msra.mxu1 %v3759_v35 }
 0x5ca   :  { %3269 = vmatprep.subr.bf16.mxu1 %v3760_v36 }
 0x5cd   :  { %3270 = vmatpush3.bf16.msra.mxu1 %v3761_v37 }
 0x5ce   :  { %3271 = vmatprep.subr.bf16.mxu1 %v3762_v38 }
 0x5d1   :  { %3272 = vmatpush3.bf16.msra.mxu1 %v3763_v39 }
 0x5d2   :  { %3273 = vmatprep.subr.bf16.mxu1 %v3764_v40 }
 0x5d5   :  { %3274 = vmatpush3.bf16.msra.mxu1 %v3765_v41 }
 0x5d6   :  { %3275 = vmatprep.subr.bf16.mxu1 %v3766_v42 }
 0x5d9   :  { %3276 = vmatpush3.bf16.msra.mxu1 %v3767_v43 }
 0x5da   :  { %3277 = vmatprep.subr.bf16.mxu1 %v3768_v44 }
 0x5dd   :  { %3278 = vmatpush3.bf16.msra.mxu1 %v3769_v45 }
 0x5de   :  { %3279 = vmatprep.subr.bf16.mxu1 %v3770_v46 }
 0x5e1   :  { %3280 = vmatpush3.bf16.msra.mxu1 %v3771_v47 }
 0x697   :  { %v2675_v48 = vpop.f32.mrb[20].mxu1 }
 0x698   :  { %vm2682_vm14 = vcmp.gt.f32.partialorder %v2675_v48, 0.0  ;;  %v2684_v49 = vmul.f32 0.01, %v2675_v48  ;;  %v2677_v50 = vpop.f32.mrb[21].mxu1 }
 0x699   :  { %vm2683_vm15 = vcmp.gt.f32.partialorder %v2677_v50, 0.0  ;;  %v2685_v51 = vmul.f32 0.01, %v2677_v50  ;;  %v2679_v52 = vpop.f32.mrb[22].mxu1 }
 0x69a   :  { %v2686_v53 = vsel %vm2682_vm14, %v2675_v48, %v2684_v49  ;;  %v2680_v54 = vpop.f32.mrb[23].mxu1 }
 0x69b   :  { %v2687_v55 = vsel %vm2683_vm15, %v2677_v50, %v2685_v51  ;;  %v2688_v58 = vpack.c.bf16 %v2686_v53, %v2686_v53 }
 0x69c   :  { %v2689_v57 = vpack.c.bf16 %v2687_v55, %v2687_v55 }
 0x69e   :  { %2850 = vmatprep.mubr.bf16.mxu1 %v2689_v57 }
 0x69f   :  { %2851 = vmatmul.mubr.bf16.vlgmr.msra.gmra.mrb[24].mxu1 %v2688_v58 }
 0x772   :  { %v3281_v59 = vpop.f32.mrb[24].mxu1 }
 0x773   :  { %v3282_v60 = vpop.f32.mrb[25].mxu1 }
 0x774   :  { %v3283_v61 = vadd.f32 %v3282_v60, %v3281_v59  ;;  %v3284_v62 = vpop.f32.mrb[26].mxu1 }
 0x775   :  { %v3285_v56 = vpop.f32.mrb[27].mxu1 }
 0x776   :  { %2858 = vst [vmem:[%s4864_s9 + $0x10] sm:$0xff] %v3283_v61 }

</bundles_post_ra>
